<compile_context>
chip_gen: v7x
topology: tpu7x:2x2x1
jax: 0.10.0
libtpu: 0.0.40
codegen_flags: <defaults>
</compile_context>

<pallas_src>
import jax
import jax.numpy as jnp
from jax import lax
from jax.experimental import pallas as pl
from jax.experimental.pallas import tpu as pltpu


# Model hyper-parameters (match the PyTorch module: input_dim=4,
# conv_archs=((1,16),(1,32)), hidden_sizes=[32,64], attention_dim=64, out=1).
IN_DIM = 4
SEQ = 16
C1, C2 = 16, 32
H1, H2 = 32, 64
OUT = 1
P1 = SEQ // 2          # length after first pool
T = SEQ // 4           # length after second pool == LSTM time steps


def _round_up(n, m):
    return (n + m - 1) // m * m


def _make_kernel(TB):
    R1 = TB * SEQ      # conv1 rows (batch * length, flattened sample-major)
    R1h = TB * P1      # rows after first pool
    R2h = TB * T       # rows after second pool (= LSTM inputs)
    f32 = jnp.float32

    def kernel(x_ref,
               wc1_ref, wc2_ref,
               wih1_ref, whh1_ref, wih2_ref, whh2_ref,
               wah_ref, wae_ref, vecs_ref,
               out_ref,
               xin1_ref, y1_ref, xin2_ref, y2_ref, xp1_ref, seq2_ref):
        # ---- unpack the packed bias / row-vector slab (one DMA for all 8) ----
        b_c1 = vecs_ref[0:1, 0:C1]
        b_c2 = vecs_ref[1:2, 0:C2]
        bL1 = vecs_ref[2:3, 0:4 * H1]
        bL2 = vecs_ref[3:4, 0:4 * H2]
        ba = vecs_ref[4:5, 0:H2]
        v_row = vecs_ref[5:6, 0:H2]
        wl_row = vecs_ref[6:7, 0:H2]
        bl = vecs_ref[7:8, 0:1]

        # ---- helpers ---------------------------------------------------------
        def conv_relu(xr, L, w_ref, b, xin_ref):
            # Conv1d(k=3, padding=1) + ReLU over row-flattened (TB*L, Cin) data.
            # The +/-1 taps are offset loads of a shift scratch; rows that would
            # cross a sample boundary (incl. the never-written scratch rows 0
            # and R+1) are masked to zero, which reproduces the zero padding.
            R, Cin = xr.shape
            xin_ref[1:R + 1, :] = xr              # only the R live rows stored
            prev = xin_ref[0:R, :]                # row r -> x[r-1]
            nxt = xin_ref[2:R + 2, :]             # row r -> x[r+1]
            pos = lax.broadcasted_iota(jnp.int32, (R, Cin), 0) % L
            prev = jnp.where(pos == 0, 0.0, prev)
            nxt = jnp.where(pos == L - 1, 0.0, nxt)
            y = (jnp.dot(prev, w_ref[0], preferred_element_type=f32)
                 + jnp.dot(xr, w_ref[1], preferred_element_type=f32)
                 + jnp.dot(nxt, w_ref[2], preferred_element_type=f32)
                 + b)
            return jnp.maximum(y, 0.0)

        def pool_halve(y_ref, rows_out):
            # MaxPool1d(kernel=2, stride=2): strided sublane loads, O(R*C).
            even = y_ref[pl.ds(0, rows_out, stride=2), :]
            odd = y_ref[pl.ds(1, rows_out, stride=2), :]
            return jnp.maximum(even, odd)

        def gates(g, H):
            i_g = jax.nn.sigmoid(g[:, 0:H])
            f_g = jax.nn.sigmoid(g[:, H:2 * H])
            g_g = jnp.tanh(g[:, 2 * H:3 * H])
            o_g = jax.nn.sigmoid(g[:, 3 * H:4 * H])
            return i_g, f_g, g_g, o_g

        # ---- CNN feature extractor (all TB samples at once) -----------------
        x = x_ref[...]                                            # (R1, IN_DIM)
        y1_ref[...] = conv_relu(x, SEQ, wc1_ref, b_c1, xin1_ref)  # (R1, C1)
        p1 = pool_halve(y1_ref, R1h)                              # (R1h, C1)
        y2_ref[...] = conv_relu(p1, P1, wc2_ref, b_c2, xin2_ref)  # (R1h, C2)
        p2 = pool_halve(y2_ref, R2h)                              # (R2h, C2)

        # ---- 2-layer LSTM stack (lockstep, layer-1 input proj hoisted) ------
        xp1_ref[...] = (jnp.dot(p2, wih1_ref[...],
                                preferred_element_type=f32) + bL1)  # (R2h, 4H1)

        h1 = jnp.zeros((TB, H1), f32)
        c1 = jnp.zeros((TB, H1), f32)
        h2 = jnp.zeros((TB, H2), f32)
        c2 = jnp.zeros((TB, H2), f32)
        for t in range(T):                        # static unroll (T == 4)
            # layer 1: rows of this timestep gathered with a stride-T load
            g1 = (xp1_ref[pl.ds(t, TB, stride=T), :]
                  + jnp.dot(h1, whh1_ref[...], preferred_element_type=f32))
            i1, f1, gg1, o1 = gates(g1, H1)
            c1 = f1 * c1 + i1 * gg1
            h1 = o1 * jnp.tanh(c1)
            # layer 2 consumes layer-1 output of the same timestep
            g2 = (jnp.dot(h1, wih2_ref[...], preferred_element_type=f32) + bL2
                  + jnp.dot(h2, whh2_ref[...], preferred_element_type=f32))
            i2, f2, gg2, o2 = gates(g2, H2)
            c2 = f2 * c2 + i2 * gg2
            h2 = o2 * jnp.tanh(c2)
            seq2_ref[t * TB:(t + 1) * TB, :] = h2            # time-major store

        # ---- Attention (hidden = final cell state of last LSTM) -------------
        hid_proj = (jnp.dot(c2, wah_ref[...],
                            preferred_element_type=f32) + ba)       # (TB, H2)
        scores = []
        for t in range(T):
            enc_t = seq2_ref[t * TB:(t + 1) * TB, :]
            e_t = jnp.tanh(jnp.dot(enc_t, wae_ref[...],
                                   preferred_element_type=f32) + hid_proj)
            # VPU multiply + lane reduce (no (TB,H)x(H,1) MXU call)
            scores.append(jnp.sum(e_t * v_row, axis=-1, keepdims=True))  # (TB,1)
        m = scores[0]
        for t in range(1, T):
            m = jnp.maximum(m, scores[t])
        exps = [jnp.exp(s - m) for s in scores]
        denom = exps[0]
        for t in range(1, T):
            denom = denom + exps[t]
        ctx = jnp.zeros((TB, H2), f32)
        for t in range(T):
            wt = exps[t] / denom                                     # (TB, 1)
            ctx = ctx + wt * seq2_ref[t * TB:(t + 1) * TB, :]

        # ---- Final Linear(H2 -> 1): VPU multiply + lane reduce --------------
        out_ref[...] = jnp.sum(ctx * wl_row, axis=-1, keepdims=True) + bl

    return kernel


def cnn_lstm_attention_forward(x, p, block_batch=128):
    B = x.shape[0]
    TB = int(min(_round_up(block_batch, 8), _round_up(B, 8)))   # multiple of 8
    B_pad = _round_up(B, TB)
    nblk = B_pad // TB
    if B_pad != B:
        x = jnp.pad(x, ((0, B_pad - B), (0, 0), (0, 0)))
    # Row-flattened (batch*length, channels) view: no in-kernel 3D reshapes.
    x2 = x.reshape(B_pad * SEQ, IN_DIM)

    # Pack the 8 small bias / row-vector params into one (8, 256) slab.
    vecs = jnp.zeros((8, 4 * H2), jnp.float32)
    vecs = vecs.at[0, :C1].set(p["b_c1"].reshape(-1))
    vecs = vecs.at[1, :C2].set(p["b_c2"].reshape(-1))
    vecs = vecs.at[2, :4 * H1].set(p["bL1"].reshape(-1))
    vecs = vecs.at[3, :4 * H2].set(p["bL2"].reshape(-1))
    vecs = vecs.at[4, :H2].set(p["ba"].reshape(-1))
    vecs = vecs.at[5, :H2].set(p["v"].reshape(-1))
    vecs = vecs.at[6, :H2].set(p["wl"].reshape(-1))
    vecs = vecs.at[7, :OUT].set(p["bl"].reshape(-1))

    const2 = lambda b: (0, 0)
    const3 = lambda b: (0, 0, 0)

    out = pl.pallas_call(
        _make_kernel(TB),
        out_shape=jax.ShapeDtypeStruct((B_pad, OUT), jnp.float32),
        grid=(nblk,),
        in_specs=[
            pl.BlockSpec((TB * SEQ, IN_DIM), lambda b: (b, 0)),    # x rows
            pl.BlockSpec((3, IN_DIM, C1), const3),                 # w_c1
            pl.BlockSpec((3, C1, C2), const3),                     # w_c2
            pl.BlockSpec((C2, 4 * H1), const2),                    # wih1
            pl.BlockSpec((H1, 4 * H1), const2),                    # whh1
            pl.BlockSpec((H1, 4 * H2), const2),                    # wih2
            pl.BlockSpec((H2, 4 * H2), const2),                    # whh2
            pl.BlockSpec((H2, H2), const2),                        # wah
            pl.BlockSpec((H2, H2), const2),                        # wae
            pl.BlockSpec((8, 4 * H2), const2),                     # packed vecs
        ],
        out_specs=pl.BlockSpec((TB, OUT), lambda b: (b, 0)),
        scratch_shapes=[
            pltpu.VMEM((TB * SEQ + 2, IN_DIM), jnp.float32),  # conv1 shift buf
            pltpu.VMEM((TB * SEQ, C1), jnp.float32),          # conv1 relu out
            pltpu.VMEM((TB * P1 + 2, C1), jnp.float32),       # conv2 shift buf
            pltpu.VMEM((TB * P1, C2), jnp.float32),           # conv2 relu out
            pltpu.VMEM((TB * T, 4 * H1), jnp.float32),        # LSTM1 input proj
            pltpu.VMEM((TB * T, H2), jnp.float32),            # LSTM2 outputs
        ],
        compiler_params=pltpu.CompilerParams(dimension_semantics=("parallel",)),
    )(x2, p["w_c1"], p["w_c2"], p["wih1"], p["whh1"], p["wih2"], p["whh2"],
      p["wah"], p["wae"], vecs)
    return out[:B]


# ----------------------------------------------------------------------------
# Pure-JAX reference (same math) for a correctness check.
# ----------------------------------------------------------------------------
def ref_forward(x, p):
    def conv(xin, w, b):
        B, L, _ = xin.shape
        xp = jnp.pad(xin, ((0, 0), (1, 1), (0, 0)))
        y = (jnp.einsum("blc,co->blo", xp[:, 0:L], w[0])
             + jnp.einsum("blc,co->blo", xp[:, 1:L + 1], w[1])
             + jnp.einsum("blc,co->blo", xp[:, 2:L + 2], w[2]) + b)
        y = jnp.maximum(y, 0.0)
        return jnp.max(y.reshape(B, L // 2, 2, y.shape[-1]), axis=2)

    def lstm(x_bt, wih, whh, b):
        Bb = x_bt.shape[0]
        H = whh.shape[0]

        def step(carry, x_t):
            h, c = carry
            g = x_t @ wih + h @ whh + b
            i = jax.nn.sigmoid(g[:, :H])
            f = jax.nn.sigmoid(g[:, H:2 * H])
            gg = jnp.tanh(g[:, 2 * H:3 * H])
            o = jax.nn.sigmoid(g[:, 3 * H:])
            c = f * c + i * gg
            h = o * jnp.tanh(c)
            return (h, c), h

        (hT, cT), ys = lax.scan(step,
                                (jnp.zeros((Bb, H)), jnp.zeros((Bb, H))),
                                jnp.transpose(x_bt, (1, 0, 2)))
        return jnp.transpose(ys, (1, 0, 2)), hT, cT

    h = conv(x, p["w_c1"], p["b_c1"])
    h = conv(h, p["w_c2"], p["b_c2"])
    y1, _, _ = lstm(h, p["wih1"], p["whh1"], p["bL1"])
    y2, _, c2 = lstm(y1, p["wih2"], p["whh2"], p["bL2"])
    pre = (jnp.einsum("bth,hd->btd", y2, p["wae"])
           + (c2 @ p["wah"])[:, None, :] + p["ba"])
    energy = jnp.tanh(pre)
    scores = jnp.einsum("bth,h->bt", energy, p["v"][0])
    wts = jax.nn.softmax(scores, axis=1)
    ctx = jnp.sum(y2 * wts[..., None], axis=1)
    return ctx @ p["wl"] + p["bl"]


if __name__ == "__main__":
    B = 2
    key = jax.random.PRNGKey(0)
    ks = jax.random.split(key, 20)
    n = lambda k, shp, s=0.1: s * jax.random.normal(k, shp, jnp.float32)

    params = {
        # conv taps stored (3, Cin, Cout) == torch (Cout, Cin, 3) transposed per tap
        "w_c1": n(ks[1], (3, IN_DIM, C1)), "b_c1": n(ks[2], (1, C1)),
        "w_c2": n(ks[3], (3, C1, C2)),     "b_c2": n(ks[4], (1, C2)),
        # LSTM 1: input 32 (= last conv channels), hidden 32 (gate order i,f,g,o)
        "wih1": n(ks[5], (C2, 4 * H1)), "whh1": n(ks[6], (H1, 4 * H1)),
        "bL1": n(ks[7], (1, 4 * H1)),
        # LSTM 2: input 32, hidden 64
        "wih2": n(ks[8], (H1, 4 * H2)), "whh2": n(ks[9], (H2, 4 * H2)),
        "bL2": n(ks[10], (1, 4 * H2)),
        # Attention: attn Linear(2H -> H) split into hidden / encoder halves;
        # v stored as a lane-dense row (1, H).
        "wah": n(ks[11], (H2, H2)), "wae": n(ks[12], (H2, H2)),
        "ba": n(ks[13], (1, H2)), "v": n(ks[14], (1, H2)),
        # Final Linear(H2 -> 1)
        "wl": n(ks[15], (H2, OUT)), "bl": n(ks[16], (1, OUT)),
    }

    x = jax.random.normal(ks[0], (B, SEQ, IN_DIM), jnp.float32)

    fwd = jax.jit(cnn_lstm_attention_forward)
    out = jax.block_until_ready(fwd(x, params))

    ref = jax.block_until_ready(ref_forward(x, params))
    err = float(jnp.max(jnp.abs(out - ref)))
    assert out.shape == (B, OUT), out.shape
    assert err < 1e-3, f"mismatch vs reference: {err}"

    print("KERNEL_OK")
</pallas_src>

<mosaic_0001>
module attributes {stable_mosaic.version = 11 : i64} {
  func.func @kernel(%arg0: i32, %arg1: memref<128x4xf32, #tpu.memory_space<vmem>>, %arg2: memref<3x4x16xf32, #tpu.memory_space<vmem>>, %arg3: memref<3x16x32xf32, #tpu.memory_space<vmem>>, %arg4: memref<32x128xf32, #tpu.memory_space<vmem>>, %arg5: memref<32x128xf32, #tpu.memory_space<vmem>>, %arg6: memref<32x256xf32, #tpu.memory_space<vmem>>, %arg7: memref<64x256xf32, #tpu.memory_space<vmem>>, %arg8: memref<64x64xf32, #tpu.memory_space<vmem>>, %arg9: memref<64x64xf32, #tpu.memory_space<vmem>>, %arg10: memref<8x256xf32, #tpu.memory_space<vmem>>, %arg11: memref<8x1xf32, #tpu.memory_space<vmem>>, %arg12: memref<130x4xf32, #tpu.memory_space<vmem>>, %arg13: memref<128x16xf32, #tpu.memory_space<vmem>>, %arg14: memref<66x16xf32, #tpu.memory_space<vmem>>, %arg15: memref<64x32xf32, #tpu.memory_space<vmem>>, %arg16: memref<32x128xf32, #tpu.memory_space<vmem>>, %arg17: memref<32x64xf32, #tpu.memory_space<vmem>>) attributes {dimension_semantics = [#tpu.dimension_semantics<parallel>], iteration_bounds = array<i64: 1>, scalar_prefetch = 0 : i64, scratch_operands = 6 : i64, tpu.core_type = #tpu.core_type<tc>, window_params = [{transform_indices = @transform_0, window_bounds = array<i64: 128, 4>}, {pipeline_mode = #tpu.pipeline_mode<synchronous>, transform_indices = @transform_1, window_bounds = array<i64: 3, 4, 16>}, {pipeline_mode = #tpu.pipeline_mode<synchronous>, transform_indices = @transform_2, window_bounds = array<i64: 3, 16, 32>}, {pipeline_mode = #tpu.pipeline_mode<synchronous>, transform_indices = @transform_3, window_bounds = array<i64: 32, 128>}, {pipeline_mode = #tpu.pipeline_mode<synchronous>, transform_indices = @transform_4, window_bounds = array<i64: 32, 128>}, {pipeline_mode = #tpu.pipeline_mode<synchronous>, transform_indices = @transform_5, window_bounds = array<i64: 32, 256>}, {pipeline_mode = #tpu.pipeline_mode<synchronous>, transform_indices = @transform_6, window_bounds = array<i64: 64, 256>}, {pipeline_mode = #tpu.pipeline_mode<synchronous>, transform_indices = @transform_7, window_bounds = array<i64: 64, 64>}, {pipeline_mode = #tpu.pipeline_mode<synchronous>, transform_indices = @transform_8, window_bounds = array<i64: 64, 64>}, {pipeline_mode = #tpu.pipeline_mode<synchronous>, transform_indices = @transform_9, window_bounds = array<i64: 8, 256>}, {transform_indices = @transform_10, window_bounds = array<i64: 8, 1>}]} {
    %c0 = arith.constant 0 : index
    %c0_0 = arith.constant 0 : index
    %0 = vector.load %arg10[%c0, %c0_0] : memref<8x256xf32, #tpu.memory_space<vmem>>, vector<1x16xf32>
    %c1 = arith.constant 1 : index
    %c0_1 = arith.constant 0 : index
    %1 = vector.load %arg10[%c1, %c0_1] : memref<8x256xf32, #tpu.memory_space<vmem>>, vector<1x32xf32>
    %c2 = arith.constant 2 : index
    %c0_2 = arith.constant 0 : index
    %2 = vector.load %arg10[%c2, %c0_2] : memref<8x256xf32, #tpu.memory_space<vmem>>, vector<1x128xf32>
    %c3 = arith.constant 3 : index
    %c0_3 = arith.constant 0 : index
    %3 = vector.load %arg10[%c3, %c0_3] : memref<8x256xf32, #tpu.memory_space<vmem>>, vector<1x256xf32>
    %c4 = arith.constant 4 : index
    %c0_4 = arith.constant 0 : index
    %4 = vector.load %arg10[%c4, %c0_4] : memref<8x256xf32, #tpu.memory_space<vmem>>, vector<1x64xf32>
    %c5 = arith.constant 5 : index
    %c0_5 = arith.constant 0 : index
    %5 = vector.load %arg10[%c5, %c0_5] : memref<8x256xf32, #tpu.memory_space<vmem>>, vector<1x64xf32>
    %c6 = arith.constant 6 : index
    %c0_6 = arith.constant 0 : index
    %6 = vector.load %arg10[%c6, %c0_6] : memref<8x256xf32, #tpu.memory_space<vmem>>, vector<1x64xf32>
    %c7 = arith.constant 7 : index
    %c0_7 = arith.constant 0 : index
    %7 = vector.load %arg10[%c7, %c0_7] : memref<8x256xf32, #tpu.memory_space<vmem>>, vector<1x1xf32>
    %c0_8 = arith.constant 0 : index
    %c0_9 = arith.constant 0 : index
    %8 = vector.load %arg1[%c0_8, %c0_9] : memref<128x4xf32, #tpu.memory_space<vmem>>, vector<128x4xf32>
    %c1_10 = arith.constant 1 : index
    %c0_11 = arith.constant 0 : index
    %9 = vector.load %arg12[%c1_10, %c0_11] : memref<130x4xf32, #tpu.memory_space<vmem>>, vector<128x4xf32>
    tpu.vector_store %arg12[%c1_10, %c0_11], %8 {strides = array<i32>} : memref<130x4xf32, #tpu.memory_space<vmem>>, vector<128x4xf32>,
    %c0_12 = arith.constant 0 : index
    %c0_13 = arith.constant 0 : index
    %10 = vector.load %arg12[%c0_12, %c0_13] : memref<130x4xf32, #tpu.memory_space<vmem>>, vector<128x4xf32>
    %c2_14 = arith.constant 2 : index
    %c0_15 = arith.constant 0 : index
    %11 = vector.load %arg12[%c2_14, %c0_15] : memref<130x4xf32, #tpu.memory_space<vmem>>, vector<128x4xf32>
    %12 = tpu.iota {dimensions = array<i32: 0>} : vector<128x4xi32>
    %c16_i32 = arith.constant 16 : i32
    %c0_i32 = arith.constant 0 : i32
    %13 = arith.cmpi eq, %c16_i32, %c0_i32 : i32
    %c1_i32 = arith.constant 1 : i32
    %14 = arith.select %13, %c1_i32, %c16_i32 : i32
    %15 = vector.broadcast %14 : i32 to vector<128x4xi32>
    %16 = arith.remsi %12, %15 : vector<128x4xi32>
    %c0_i32_16 = arith.constant 0 : i32
    %17 = vector.broadcast %c0_i32_16 : i32 to vector<128x4xi32>
    %18 = arith.cmpi ne, %16, %17 : vector<128x4xi32>
    %c0_i32_17 = arith.constant 0 : i32
    %19 = vector.broadcast %c0_i32_17 : i32 to vector<128x4xi32>
    %20 = arith.cmpi slt, %16, %19 : vector<128x4xi32>
    %c0_i32_18 = arith.constant 0 : i32
    %21 = arith.cmpi slt, %14, %c0_i32_18 : i32
    %22 = vector.broadcast %21 : i1 to vector<128x4xi1>
    %23 = vector.broadcast %22 : vector<128x4xi1> to vector<128x4xi1>
    %24 = arith.xori %20, %23 : vector<128x4xi1>
    %25 = arith.andi %24, %18 : vector<128x4xi1>
    %26 = vector.broadcast %14 : i32 to vector<128x4xi32>
    %27 = arith.addi %16, %26 : vector<128x4xi32>
    %28 = arith.select %25, %27, %16 : vector<128x4xi1>, vector<128x4xi32>
    %c0_i32_19 = arith.constant 0 : i32
    %29 = vector.broadcast %c0_i32_19 : i32 to vector<128x4xi32>
    %30 = arith.cmpi eq, %28, %29 : vector<128x4xi32>
    %cst = arith.constant 0.000000e+00 : f32
    %31 = vector.broadcast %cst : f32 to vector<128x4xf32>
    %32 = arith.select %30, %31, %10 : vector<128x4xi1>, vector<128x4xf32>
    %c15_i32 = arith.constant 15 : i32
    %33 = vector.broadcast %c15_i32 : i32 to vector<128x4xi32>
    %34 = arith.cmpi eq, %28, %33 : vector<128x4xi32>
    %cst_20 = arith.constant 0.000000e+00 : f32
    %35 = vector.broadcast %cst_20 : f32 to vector<128x4xf32>
    %36 = arith.select %34, %35, %11 : vector<128x4xi1>, vector<128x4xf32>
    %c0_21 = arith.constant 0 : index
    %c0_22 = arith.constant 0 : index
    %c0_23 = arith.constant 0 : index
    %37 = vector.load %arg2[%c0_21, %c0_22, %c0_23] : memref<3x4x16xf32, #tpu.memory_space<vmem>>, vector<1x4x16xf32>
    %38 = vector.shape_cast %37 : vector<1x4x16xf32> to vector<4x16xf32>
    %cst_24 = arith.constant dense<0.000000e+00> : vector<128x16xf32>
    %39 = tpu.matmul %32, %38, %cst_24 {dimension_numbers = #tpu.dot_dimension_numbers<[1], [0], [0], [1], [0, 0, 1, 1], [], []>} : vector<128x4xf32>, vector<4x16xf32>, vector<128x16xf32> -> vector<128x16xf32>
    %c1_25 = arith.constant 1 : index
    %c0_26 = arith.constant 0 : index
    %c0_27 = arith.constant 0 : index
    %40 = vector.load %arg2[%c1_25, %c0_26, %c0_27] : memref<3x4x16xf32, #tpu.memory_space<vmem>>, vector<1x4x16xf32>
    %41 = vector.shape_cast %40 : vector<1x4x16xf32> to vector<4x16xf32>
    %cst_28 = arith.constant dense<0.000000e+00> : vector<128x16xf32>
    %42 = tpu.matmul %8, %41, %cst_28 {dimension_numbers = #tpu.dot_dimension_numbers<[1], [0], [0], [1], [0, 0, 1, 1], [], []>} : vector<128x4xf32>, vector<4x16xf32>, vector<128x16xf32> -> vector<128x16xf32>
    %43 = arith.addf %39, %42 : vector<128x16xf32>
    %c2_29 = arith.constant 2 : index
    %c0_30 = arith.constant 0 : index
    %c0_31 = arith.constant 0 : index
    %44 = vector.load %arg2[%c2_29, %c0_30, %c0_31] : memref<3x4x16xf32, #tpu.memory_space<vmem>>, vector<1x4x16xf32>
    %45 = vector.shape_cast %44 : vector<1x4x16xf32> to vector<4x16xf32>
    %cst_32 = arith.constant dense<0.000000e+00> : vector<128x16xf32>
    %46 = tpu.matmul %36, %45, %cst_32 {dimension_numbers = #tpu.dot_dimension_numbers<[1], [0], [0], [1], [0, 0, 1, 1], [], []>} : vector<128x4xf32>, vector<4x16xf32>, vector<128x16xf32> -> vector<128x16xf32>
    %47 = arith.addf %43, %46 : vector<128x16xf32>
    %48 = vector.broadcast %0 : vector<1x16xf32> to vector<128x16xf32>
    %49 = arith.addf %47, %48 : vector<128x16xf32>
    %cst_33 = arith.constant 0.000000e+00 : f32
    %50 = vector.broadcast %cst_33 : f32 to vector<128x16xf32>
    %51 = arith.maximumf %49, %50 : vector<128x16xf32>
    %c0_34 = arith.constant 0 : index
    %c0_35 = arith.constant 0 : index
    %52 = vector.load %arg13[%c0_34, %c0_35] : memref<128x16xf32, #tpu.memory_space<vmem>>, vector<128x16xf32>
    tpu.vector_store %arg13[%c0_34, %c0_35], %51 {strides = array<i32>} : memref<128x16xf32, #tpu.memory_space<vmem>>, vector<128x16xf32>,
    %c0_36 = arith.constant 0 : index
    %c0_37 = arith.constant 0 : index
    %53 = tpu.strided_load %arg13[%c0_36, %c0_37] {strides = array<i32: 2, 1>} : memref<128x16xf32, #tpu.memory_space<vmem>>, vector<64x16xf32>
    %c1_38 = arith.constant 1 : index
    %c0_39 = arith.constant 0 : index
    %54 = tpu.strided_load %arg13[%c1_38, %c0_39] {strides = array<i32: 2, 1>} : memref<128x16xf32, #tpu.memory_space<vmem>>, vector<64x16xf32>
    %55 = arith.maximumf %53, %54 : vector<64x16xf32>
    %c1_40 = arith.constant 1 : index
    %c0_41 = arith.constant 0 : index
    %56 = vector.load %arg14[%c1_40, %c0_41] : memref<66x16xf32, #tpu.memory_space<vmem>>, vector<64x16xf32>
    tpu.vector_store %arg14[%c1_40, %c0_41], %55 {strides = array<i32>} : memref<66x16xf32, #tpu.memory_space<vmem>>, vector<64x16xf32>,
    %c0_42 = arith.constant 0 : index
    %c0_43 = arith.constant 0 : index
    %57 = vector.load %arg14[%c0_42, %c0_43] : memref<66x16xf32, #tpu.memory_space<vmem>>, vector<64x16xf32>
    %c2_44 = arith.constant 2 : index
    %c0_45 = arith.constant 0 : index
    %58 = vector.load %arg14[%c2_44, %c0_45] : memref<66x16xf32, #tpu.memory_space<vmem>>, vector<64x16xf32>
    %59 = tpu.iota {dimensions = array<i32: 0>} : vector<64x16xi32>
    %c8_i32 = arith.constant 8 : i32
    %c0_i32_46 = arith.constant 0 : i32
    %60 = arith.cmpi eq, %c8_i32, %c0_i32_46 : i32
    %c1_i32_47 = arith.constant 1 : i32
    %61 = arith.select %60, %c1_i32_47, %c8_i32 : i32
    %62 = vector.broadcast %61 : i32 to vector<64x16xi32>
    %63 = arith.remsi %59, %62 : vector<64x16xi32>
    %c0_i32_48 = arith.constant 0 : i32
    %64 = vector.broadcast %c0_i32_48 : i32 to vector<64x16xi32>
    %65 = arith.cmpi ne, %63, %64 : vector<64x16xi32>
    %c0_i32_49 = arith.constant 0 : i32
    %66 = vector.broadcast %c0_i32_49 : i32 to vector<64x16xi32>
    %67 = arith.cmpi slt, %63, %66 : vector<64x16xi32>
    %c0_i32_50 = arith.constant 0 : i32
    %68 = arith.cmpi slt, %61, %c0_i32_50 : i32
    %69 = vector.broadcast %68 : i1 to vector<64x16xi1>
    %70 = vector.broadcast %69 : vector<64x16xi1> to vector<64x16xi1>
    %71 = arith.xori %67, %70 : vector<64x16xi1>
    %72 = arith.andi %71, %65 : vector<64x16xi1>
    %73 = vector.broadcast %61 : i32 to vector<64x16xi32>
    %74 = arith.addi %63, %73 : vector<64x16xi32>
    %75 = arith.select %72, %74, %63 : vector<64x16xi1>, vector<64x16xi32>
    %c0_i32_51 = arith.constant 0 : i32
    %76 = vector.broadcast %c0_i32_51 : i32 to vector<64x16xi32>
    %77 = arith.cmpi eq, %75, %76 : vector<64x16xi32>
    %cst_52 = arith.constant 0.000000e+00 : f32
    %78 = vector.broadcast %cst_52 : f32 to vector<64x16xf32>
    %79 = arith.select %77, %78, %57 : vector<64x16xi1>, vector<64x16xf32>
    %c7_i32 = arith.constant 7 : i32
    %80 = vector.broadcast %c7_i32 : i32 to vector<64x16xi32>
    %81 = arith.cmpi eq, %75, %80 : vector<64x16xi32>
    %cst_53 = arith.constant 0.000000e+00 : f32
    %82 = vector.broadcast %cst_53 : f32 to vector<64x16xf32>
    %83 = arith.select %81, %82, %58 : vector<64x16xi1>, vector<64x16xf32>
    %c0_54 = arith.constant 0 : index
    %c0_55 = arith.constant 0 : index
    %c0_56 = arith.constant 0 : index
    %84 = vector.load %arg3[%c0_54, %c0_55, %c0_56] : memref<3x16x32xf32, #tpu.memory_space<vmem>>, vector<1x16x32xf32>
    %85 = vector.shape_cast %84 : vector<1x16x32xf32> to vector<16x32xf32>
    %cst_57 = arith.constant dense<0.000000e+00> : vector<64x32xf32>
    %86 = tpu.matmul %79, %85, %cst_57 {dimension_numbers = #tpu.dot_dimension_numbers<[1], [0], [0], [1], [0, 0, 1, 1], [], []>} : vector<64x16xf32>, vector<16x32xf32>, vector<64x32xf32> -> vector<64x32xf32>
    %c1_58 = arith.constant 1 : index
    %c0_59 = arith.constant 0 : index
    %c0_60 = arith.constant 0 : index
    %87 = vector.load %arg3[%c1_58, %c0_59, %c0_60] : memref<3x16x32xf32, #tpu.memory_space<vmem>>, vector<1x16x32xf32>
    %88 = vector.shape_cast %87 : vector<1x16x32xf32> to vector<16x32xf32>
    %cst_61 = arith.constant dense<0.000000e+00> : vector<64x32xf32>
    %89 = tpu.matmul %55, %88, %cst_61 {dimension_numbers = #tpu.dot_dimension_numbers<[1], [0], [0], [1], [0, 0, 1, 1], [], []>} : vector<64x16xf32>, vector<16x32xf32>, vector<64x32xf32> -> vector<64x32xf32>
    %90 = arith.addf %86, %89 : vector<64x32xf32>
    %c2_62 = arith.constant 2 : index
    %c0_63 = arith.constant 0 : index
    %c0_64 = arith.constant 0 : index
    %91 = vector.load %arg3[%c2_62, %c0_63, %c0_64] : memref<3x16x32xf32, #tpu.memory_space<vmem>>, vector<1x16x32xf32>
    %92 = vector.shape_cast %91 : vector<1x16x32xf32> to vector<16x32xf32>
    %cst_65 = arith.constant dense<0.000000e+00> : vector<64x32xf32>
    %93 = tpu.matmul %83, %92, %cst_65 {dimension_numbers = #tpu.dot_dimension_numbers<[1], [0], [0], [1], [0, 0, 1, 1], [], []>} : vector<64x16xf32>, vector<16x32xf32>, vector<64x32xf32> -> vector<64x32xf32>
    %94 = arith.addf %90, %93 : vector<64x32xf32>
    %95 = vector.broadcast %1 : vector<1x32xf32> to vector<64x32xf32>
    %96 = arith.addf %94, %95 : vector<64x32xf32>
    %cst_66 = arith.constant 0.000000e+00 : f32
    %97 = vector.broadcast %cst_66 : f32 to vector<64x32xf32>
    %98 = arith.maximumf %96, %97 : vector<64x32xf32>
    %c0_67 = arith.constant 0 : index
    %c0_68 = arith.constant 0 : index
    %99 = vector.load %arg15[%c0_67, %c0_68] : memref<64x32xf32, #tpu.memory_space<vmem>>, vector<64x32xf32>
    tpu.vector_store %arg15[%c0_67, %c0_68], %98 {strides = array<i32>} : memref<64x32xf32, #tpu.memory_space<vmem>>, vector<64x32xf32>,
    %c0_69 = arith.constant 0 : index
    %c0_70 = arith.constant 0 : index
    %100 = tpu.strided_load %arg15[%c0_69, %c0_70] {strides = array<i32: 2, 1>} : memref<64x32xf32, #tpu.memory_space<vmem>>, vector<32x32xf32>
    %c1_71 = arith.constant 1 : index
    %c0_72 = arith.constant 0 : index
    %101 = tpu.strided_load %arg15[%c1_71, %c0_72] {strides = array<i32: 2, 1>} : memref<64x32xf32, #tpu.memory_space<vmem>>, vector<32x32xf32>
    %102 = arith.maximumf %100, %101 : vector<32x32xf32>
    %c0_73 = arith.constant 0 : index
    %c0_74 = arith.constant 0 : index
    %103 = vector.load %arg4[%c0_73, %c0_74] : memref<32x128xf32, #tpu.memory_space<vmem>>, vector<32x128xf32>
    %cst_75 = arith.constant dense<0.000000e+00> : vector<32x128xf32>
    %104 = tpu.matmul %102, %103, %cst_75 {dimension_numbers = #tpu.dot_dimension_numbers<[1], [0], [0], [1], [0, 0, 1, 1], [], []>} : vector<32x32xf32>, vector<32x128xf32>, vector<32x128xf32> -> vector<32x128xf32>
    %105 = vector.broadcast %2 : vector<1x128xf32> to vector<32x128xf32>
    %106 = arith.addf %104, %105 : vector<32x128xf32>
    %c0_76 = arith.constant 0 : index
    %c0_77 = arith.constant 0 : index
    %107 = vector.load %arg16[%c0_76, %c0_77] : memref<32x128xf32, #tpu.memory_space<vmem>>, vector<32x128xf32>
    tpu.vector_store %arg16[%c0_76, %c0_77], %106 {strides = array<i32>} : memref<32x128xf32, #tpu.memory_space<vmem>>, vector<32x128xf32>,
    %cst_78 = arith.constant 0.000000e+00 : f32
    %108 = vector.broadcast %cst_78 : f32 to vector<8x32xf32>
    %cst_79 = arith.constant 0.000000e+00 : f32
    %109 = vector.broadcast %cst_79 : f32 to vector<8x32xf32>
    %cst_80 = arith.constant 0.000000e+00 : f32
    %110 = vector.broadcast %cst_80 : f32 to vector<8x64xf32>
    %cst_81 = arith.constant 0.000000e+00 : f32
    %111 = vector.broadcast %cst_81 : f32 to vector<8x64xf32>
    %c0_82 = arith.constant 0 : index
    %c0_83 = arith.constant 0 : index
    %112 = tpu.strided_load %arg16[%c0_82, %c0_83] {strides = array<i32: 4, 1>} : memref<32x128xf32, #tpu.memory_space<vmem>>, vector<8x128xf32>
    %c0_84 = arith.constant 0 : index
    %c0_85 = arith.constant 0 : index
    %113 = vector.load %arg5[%c0_84, %c0_85] : memref<32x128xf32, #tpu.memory_space<vmem>>, vector<32x128xf32>
    %cst_86 = arith.constant dense<0.000000e+00> : vector<8x128xf32>
    %114 = tpu.matmul %108, %113, %cst_86 {dimension_numbers = #tpu.dot_dimension_numbers<[1], [0], [0], [1], [0, 0, 1, 1], [], []>} : vector<8x32xf32>, vector<32x128xf32>, vector<8x128xf32> -> vector<8x128xf32>
    %115 = arith.addf %112, %114 : vector<8x128xf32>
    %116 = vector.extract_strided_slice %115 {offsets = [0, 0], sizes = [8, 32], strides = [1, 1]} : vector<8x128xf32> to vector<8x32xf32>
    %117 = arith.negf %116 : vector<8x32xf32>
    %118 = math.exp %117 : vector<8x32xf32>
    %cst_87 = arith.constant 1.000000e+00 : f32
    %119 = vector.broadcast %cst_87 : f32 to vector<8x32xf32>
    %120 = arith.addf %119, %118 : vector<8x32xf32>
    %121 = arith.divf %119, %120 : vector<8x32xf32>
    %122 = vector.extract_strided_slice %115 {offsets = [0, 32], sizes = [8, 32], strides = [1, 1]} : vector<8x128xf32> to vector<8x32xf32>
    %123 = arith.negf %122 : vector<8x32xf32>
    %124 = math.exp %123 : vector<8x32xf32>
    %cst_88 = arith.constant 1.000000e+00 : f32
    %125 = vector.broadcast %cst_88 : f32 to vector<8x32xf32>
    %126 = arith.addf %125, %124 : vector<8x32xf32>
    %127 = arith.divf %125, %126 : vector<8x32xf32>
    %128 = vector.extract_strided_slice %115 {offsets = [0, 64], sizes = [8, 32], strides = [1, 1]} : vector<8x128xf32> to vector<8x32xf32>
    %129 = math.tanh %128 : vector<8x32xf32>
    %130 = vector.extract_strided_slice %115 {offsets = [0, 96], sizes = [8, 32], strides = [1, 1]} : vector<8x128xf32> to vector<8x32xf32>
    %131 = arith.negf %130 : vector<8x32xf32>
    %132 = math.exp %131 : vector<8x32xf32>
    %cst_89 = arith.constant 1.000000e+00 : f32
    %133 = vector.broadcast %cst_89 : f32 to vector<8x32xf32>
    %134 = arith.addf %133, %132 : vector<8x32xf32>
    %135 = arith.divf %133, %134 : vector<8x32xf32>
    %136 = arith.mulf %127, %109 : vector<8x32xf32>
    %137 = arith.mulf %121, %129 : vector<8x32xf32>
    %138 = arith.addf %136, %137 : vector<8x32xf32>
    %139 = math.tanh %138 : vector<8x32xf32>
    %140 = arith.mulf %135, %139 : vector<8x32xf32>
    %c0_90 = arith.constant 0 : index
    %c0_91 = arith.constant 0 : index
    %141 = vector.load %arg6[%c0_90, %c0_91] : memref<32x256xf32, #tpu.memory_space<vmem>>, vector<32x256xf32>
    %cst_92 = arith.constant dense<0.000000e+00> : vector<8x256xf32>
    %142 = tpu.matmul %140, %141, %cst_92 {dimension_numbers = #tpu.dot_dimension_numbers<[1], [0], [0], [1], [0, 0, 1, 1], [], []>} : vector<8x32xf32>, vector<32x256xf32>, vector<8x256xf32> -> vector<8x256xf32>
    %143 = vector.broadcast %3 : vector<1x256xf32> to vector<8x256xf32>
    %144 = arith.addf %142, %143 : vector<8x256xf32>
    %c0_93 = arith.constant 0 : index
    %c0_94 = arith.constant 0 : index
    %145 = vector.load %arg7[%c0_93, %c0_94] : memref<64x256xf32, #tpu.memory_space<vmem>>, vector<64x256xf32>
    %cst_95 = arith.constant dense<0.000000e+00> : vector<8x256xf32>
    %146 = tpu.matmul %110, %145, %cst_95 {dimension_numbers = #tpu.dot_dimension_numbers<[1], [0], [0], [1], [0, 0, 1, 1], [], []>} : vector<8x64xf32>, vector<64x256xf32>, vector<8x256xf32> -> vector<8x256xf32>
    %147 = arith.addf %144, %146 : vector<8x256xf32>
    %148 = vector.extract_strided_slice %147 {offsets = [0, 0], sizes = [8, 64], strides = [1, 1]} : vector<8x256xf32> to vector<8x64xf32>
    %149 = arith.negf %148 : vector<8x64xf32>
    %150 = math.exp %149 : vector<8x64xf32>
    %cst_96 = arith.constant 1.000000e+00 : f32
    %151 = vector.broadcast %cst_96 : f32 to vector<8x64xf32>
    %152 = arith.addf %151, %150 : vector<8x64xf32>
    %153 = arith.divf %151, %152 : vector<8x64xf32>
    %154 = vector.extract_strided_slice %147 {offsets = [0, 64], sizes = [8, 64], strides = [1, 1]} : vector<8x256xf32> to vector<8x64xf32>
    %155 = arith.negf %154 : vector<8x64xf32>
    %156 = math.exp %155 : vector<8x64xf32>
    %cst_97 = arith.constant 1.000000e+00 : f32
    %157 = vector.broadcast %cst_97 : f32 to vector<8x64xf32>
    %158 = arith.addf %157, %156 : vector<8x64xf32>
    %159 = arith.divf %157, %158 : vector<8x64xf32>
    %160 = vector.extract_strided_slice %147 {offsets = [0, 128], sizes = [8, 64], strides = [1, 1]} : vector<8x256xf32> to vector<8x64xf32>
    %161 = math.tanh %160 : vector<8x64xf32>
    %162 = vector.extract_strided_slice %147 {offsets = [0, 192], sizes = [8, 64], strides = [1, 1]} : vector<8x256xf32> to vector<8x64xf32>
    %163 = arith.negf %162 : vector<8x64xf32>
    %164 = math.exp %163 : vector<8x64xf32>
    %cst_98 = arith.constant 1.000000e+00 : f32
    %165 = vector.broadcast %cst_98 : f32 to vector<8x64xf32>
    %166 = arith.addf %165, %164 : vector<8x64xf32>
    %167 = arith.divf %165, %166 : vector<8x64xf32>
    %168 = arith.mulf %159, %111 : vector<8x64xf32>
    %169 = arith.mulf %153, %161 : vector<8x64xf32>
    %170 = arith.addf %168, %169 : vector<8x64xf32>
    %171 = math.tanh %170 : vector<8x64xf32>
    %172 = arith.mulf %167, %171 : vector<8x64xf32>
    %c0_99 = arith.constant 0 : index
    %c0_100 = arith.constant 0 : index
    %173 = vector.load %arg17[%c0_99, %c0_100] : memref<32x64xf32, #tpu.memory_space<vmem>>, vector<8x64xf32>
    tpu.vector_store %arg17[%c0_99, %c0_100], %172 {strides = array<i32>} : memref<32x64xf32, #tpu.memory_space<vmem>>, vector<8x64xf32>,
    %c1_101 = arith.constant 1 : index
    %c0_102 = arith.constant 0 : index
    %174 = tpu.strided_load %arg16[%c1_101, %c0_102] {strides = array<i32: 4, 1>} : memref<32x128xf32, #tpu.memory_space<vmem>>, vector<8x128xf32>
    %c0_103 = arith.constant 0 : index
    %c0_104 = arith.constant 0 : index
    %175 = vector.load %arg5[%c0_103, %c0_104] : memref<32x128xf32, #tpu.memory_space<vmem>>, vector<32x128xf32>
    %cst_105 = arith.constant dense<0.000000e+00> : vector<8x128xf32>
    %176 = tpu.matmul %140, %175, %cst_105 {dimension_numbers = #tpu.dot_dimension_numbers<[1], [0], [0], [1], [0, 0, 1, 1], [], []>} : vector<8x32xf32>, vector<32x128xf32>, vector<8x128xf32> -> vector<8x128xf32>
    %177 = arith.addf %174, %176 : vector<8x128xf32>
    %178 = vector.extract_strided_slice %177 {offsets = [0, 0], sizes = [8, 32], strides = [1, 1]} : vector<8x128xf32> to vector<8x32xf32>
    %179 = arith.negf %178 : vector<8x32xf32>
    %180 = math.exp %179 : vector<8x32xf32>
    %cst_106 = arith.constant 1.000000e+00 : f32
    %181 = vector.broadcast %cst_106 : f32 to vector<8x32xf32>
    %182 = arith.addf %181, %180 : vector<8x32xf32>
    %183 = arith.divf %181, %182 : vector<8x32xf32>
    %184 = vector.extract_strided_slice %177 {offsets = [0, 32], sizes = [8, 32], strides = [1, 1]} : vector<8x128xf32> to vector<8x32xf32>
    %185 = arith.negf %184 : vector<8x32xf32>
    %186 = math.exp %185 : vector<8x32xf32>
    %cst_107 = arith.constant 1.000000e+00 : f32
    %187 = vector.broadcast %cst_107 : f32 to vector<8x32xf32>
    %188 = arith.addf %187, %186 : vector<8x32xf32>
    %189 = arith.divf %187, %188 : vector<8x32xf32>
    %190 = vector.extract_strided_slice %177 {offsets = [0, 64], sizes = [8, 32], strides = [1, 1]} : vector<8x128xf32> to vector<8x32xf32>
    %191 = math.tanh %190 : vector<8x32xf32>
    %192 = vector.extract_strided_slice %177 {offsets = [0, 96], sizes = [8, 32], strides = [1, 1]} : vector<8x128xf32> to vector<8x32xf32>
    %193 = arith.negf %192 : vector<8x32xf32>
    %194 = math.exp %193 : vector<8x32xf32>
    %cst_108 = arith.constant 1.000000e+00 : f32
    %195 = vector.broadcast %cst_108 : f32 to vector<8x32xf32>
    %196 = arith.addf %195, %194 : vector<8x32xf32>
    %197 = arith.divf %195, %196 : vector<8x32xf32>
    %198 = arith.mulf %189, %138 : vector<8x32xf32>
    %199 = arith.mulf %183, %191 : vector<8x32xf32>
    %200 = arith.addf %198, %199 : vector<8x32xf32>
    %201 = math.tanh %200 : vector<8x32xf32>
    %202 = arith.mulf %197, %201 : vector<8x32xf32>
    %c0_109 = arith.constant 0 : index
    %c0_110 = arith.constant 0 : index
    %203 = vector.load %arg6[%c0_109, %c0_110] : memref<32x256xf32, #tpu.memory_space<vmem>>, vector<32x256xf32>
    %cst_111 = arith.constant dense<0.000000e+00> : vector<8x256xf32>
    %204 = tpu.matmul %202, %203, %cst_111 {dimension_numbers = #tpu.dot_dimension_numbers<[1], [0], [0], [1], [0, 0, 1, 1], [], []>} : vector<8x32xf32>, vector<32x256xf32>, vector<8x256xf32> -> vector<8x256xf32>
    %205 = vector.broadcast %3 : vector<1x256xf32> to vector<8x256xf32>
    %206 = arith.addf %204, %205 : vector<8x256xf32>
    %c0_112 = arith.constant 0 : index
    %c0_113 = arith.constant 0 : index
    %207 = vector.load %arg7[%c0_112, %c0_113] : memref<64x256xf32, #tpu.memory_space<vmem>>, vector<64x256xf32>
    %cst_114 = arith.constant dense<0.000000e+00> : vector<8x256xf32>
    %208 = tpu.matmul %172, %207, %cst_114 {dimension_numbers = #tpu.dot_dimension_numbers<[1], [0], [0], [1], [0, 0, 1, 1], [], []>} : vector<8x64xf32>, vector<64x256xf32>, vector<8x256xf32> -> vector<8x256xf32>
    %209 = arith.addf %206, %208 : vector<8x256xf32>
    %210 = vector.extract_strided_slice %209 {offsets = [0, 0], sizes = [8, 64], strides = [1, 1]} : vector<8x256xf32> to vector<8x64xf32>
    %211 = arith.negf %210 : vector<8x64xf32>
    %212 = math.exp %211 : vector<8x64xf32>
    %cst_115 = arith.constant 1.000000e+00 : f32
    %213 = vector.broadcast %cst_115 : f32 to vector<8x64xf32>
    %214 = arith.addf %213, %212 : vector<8x64xf32>
    %215 = arith.divf %213, %214 : vector<8x64xf32>
    %216 = vector.extract_strided_slice %209 {offsets = [0, 64], sizes = [8, 64], strides = [1, 1]} : vector<8x256xf32> to vector<8x64xf32>
    %217 = arith.negf %216 : vector<8x64xf32>
    %218 = math.exp %217 : vector<8x64xf32>
    %cst_116 = arith.constant 1.000000e+00 : f32
    %219 = vector.broadcast %cst_116 : f32 to vector<8x64xf32>
    %220 = arith.addf %219, %218 : vector<8x64xf32>
    %221 = arith.divf %219, %220 : vector<8x64xf32>
    %222 = vector.extract_strided_slice %209 {offsets = [0, 128], sizes = [8, 64], strides = [1, 1]} : vector<8x256xf32> to vector<8x64xf32>
    %223 = math.tanh %222 : vector<8x64xf32>
    %224 = vector.extract_strided_slice %209 {offsets = [0, 192], sizes = [8, 64], strides = [1, 1]} : vector<8x256xf32> to vector<8x64xf32>
    %225 = arith.negf %224 : vector<8x64xf32>
    %226 = math.exp %225 : vector<8x64xf32>
    %cst_117 = arith.constant 1.000000e+00 : f32
    %227 = vector.broadcast %cst_117 : f32 to vector<8x64xf32>
    %228 = arith.addf %227, %226 : vector<8x64xf32>
    %229 = arith.divf %227, %228 : vector<8x64xf32>
    %230 = arith.mulf %221, %170 : vector<8x64xf32>
    %231 = arith.mulf %215, %223 : vector<8x64xf32>
    %232 = arith.addf %230, %231 : vector<8x64xf32>
    %233 = math.tanh %232 : vector<8x64xf32>
    %234 = arith.mulf %229, %233 : vector<8x64xf32>
    %c8 = arith.constant 8 : index
    %c0_118 = arith.constant 0 : index
    %235 = vector.load %arg17[%c8, %c0_118] : memref<32x64xf32, #tpu.memory_space<vmem>>, vector<8x64xf32>
    tpu.vector_store %arg17[%c8, %c0_118], %234 {strides = array<i32>} : memref<32x64xf32, #tpu.memory_space<vmem>>, vector<8x64xf32>,
    %c2_119 = arith.constant 2 : index
    %c0_120 = arith.constant 0 : index
    %236 = tpu.strided_load %arg16[%c2_119, %c0_120] {strides = array<i32: 4, 1>} : memref<32x128xf32, #tpu.memory_space<vmem>>, vector<8x128xf32>
    %c0_121 = arith.constant 0 : index
    %c0_122 = arith.constant 0 : index
    %237 = vector.load %arg5[%c0_121, %c0_122] : memref<32x128xf32, #tpu.memory_space<vmem>>, vector<32x128xf32>
    %cst_123 = arith.constant dense<0.000000e+00> : vector<8x128xf32>
    %238 = tpu.matmul %202, %237, %cst_123 {dimension_numbers = #tpu.dot_dimension_numbers<[1], [0], [0], [1], [0, 0, 1, 1], [], []>} : vector<8x32xf32>, vector<32x128xf32>, vector<8x128xf32> -> vector<8x128xf32>
    %239 = arith.addf %236, %238 : vector<8x128xf32>
    %240 = vector.extract_strided_slice %239 {offsets = [0, 0], sizes = [8, 32], strides = [1, 1]} : vector<8x128xf32> to vector<8x32xf32>
    %241 = arith.negf %240 : vector<8x32xf32>
    %242 = math.exp %241 : vector<8x32xf32>
    %cst_124 = arith.constant 1.000000e+00 : f32
    %243 = vector.broadcast %cst_124 : f32 to vector<8x32xf32>
    %244 = arith.addf %243, %242 : vector<8x32xf32>
    %245 = arith.divf %243, %244 : vector<8x32xf32>
    %246 = vector.extract_strided_slice %239 {offsets = [0, 32], sizes = [8, 32], strides = [1, 1]} : vector<8x128xf32> to vector<8x32xf32>
    %247 = arith.negf %246 : vector<8x32xf32>
    %248 = math.exp %247 : vector<8x32xf32>
    %cst_125 = arith.constant 1.000000e+00 : f32
    %249 = vector.broadcast %cst_125 : f32 to vector<8x32xf32>
    %250 = arith.addf %249, %248 : vector<8x32xf32>
    %251 = arith.divf %249, %250 : vector<8x32xf32>
    %252 = vector.extract_strided_slice %239 {offsets = [0, 64], sizes = [8, 32], strides = [1, 1]} : vector<8x128xf32> to vector<8x32xf32>
    %253 = math.tanh %252 : vector<8x32xf32>
    %254 = vector.extract_strided_slice %239 {offsets = [0, 96], sizes = [8, 32], strides = [1, 1]} : vector<8x128xf32> to vector<8x32xf32>
    %255 = arith.negf %254 : vector<8x32xf32>
    %256 = math.exp %255 : vector<8x32xf32>
    %cst_126 = arith.constant 1.000000e+00 : f32
    %257 = vector.broadcast %cst_126 : f32 to vector<8x32xf32>
    %258 = arith.addf %257, %256 : vector<8x32xf32>
    %259 = arith.divf %257, %258 : vector<8x32xf32>
    %260 = arith.mulf %251, %200 : vector<8x32xf32>
    %261 = arith.mulf %245, %253 : vector<8x32xf32>
    %262 = arith.addf %260, %261 : vector<8x32xf32>
    %263 = math.tanh %262 : vector<8x32xf32>
    %264 = arith.mulf %259, %263 : vector<8x32xf32>
    %c0_127 = arith.constant 0 : index
    %c0_128 = arith.constant 0 : index
    %265 = vector.load %arg6[%c0_127, %c0_128] : memref<32x256xf32, #tpu.memory_space<vmem>>, vector<32x256xf32>
    %cst_129 = arith.constant dense<0.000000e+00> : vector<8x256xf32>
    %266 = tpu.matmul %264, %265, %cst_129 {dimension_numbers = #tpu.dot_dimension_numbers<[1], [0], [0], [1], [0, 0, 1, 1], [], []>} : vector<8x32xf32>, vector<32x256xf32>, vector<8x256xf32> -> vector<8x256xf32>
    %267 = vector.broadcast %3 : vector<1x256xf32> to vector<8x256xf32>
    %268 = arith.addf %266, %267 : vector<8x256xf32>
    %c0_130 = arith.constant 0 : index
    %c0_131 = arith.constant 0 : index
    %269 = vector.load %arg7[%c0_130, %c0_131] : memref<64x256xf32, #tpu.memory_space<vmem>>, vector<64x256xf32>
    %cst_132 = arith.constant dense<0.000000e+00> : vector<8x256xf32>
    %270 = tpu.matmul %234, %269, %cst_132 {dimension_numbers = #tpu.dot_dimension_numbers<[1], [0], [0], [1], [0, 0, 1, 1], [], []>} : vector<8x64xf32>, vector<64x256xf32>, vector<8x256xf32> -> vector<8x256xf32>
    %271 = arith.addf %268, %270 : vector<8x256xf32>
    %272 = vector.extract_strided_slice %271 {offsets = [0, 0], sizes = [8, 64], strides = [1, 1]} : vector<8x256xf32> to vector<8x64xf32>
    %273 = arith.negf %272 : vector<8x64xf32>
    %274 = math.exp %273 : vector<8x64xf32>
    %cst_133 = arith.constant 1.000000e+00 : f32
    %275 = vector.broadcast %cst_133 : f32 to vector<8x64xf32>
    %276 = arith.addf %275, %274 : vector<8x64xf32>
    %277 = arith.divf %275, %276 : vector<8x64xf32>
    %278 = vector.extract_strided_slice %271 {offsets = [0, 64], sizes = [8, 64], strides = [1, 1]} : vector<8x256xf32> to vector<8x64xf32>
    %279 = arith.negf %278 : vector<8x64xf32>
    %280 = math.exp %279 : vector<8x64xf32>
    %cst_134 = arith.constant 1.000000e+00 : f32
    %281 = vector.broadcast %cst_134 : f32 to vector<8x64xf32>
    %282 = arith.addf %281, %280 : vector<8x64xf32>
    %283 = arith.divf %281, %282 : vector<8x64xf32>
    %284 = vector.extract_strided_slice %271 {offsets = [0, 128], sizes = [8, 64], strides = [1, 1]} : vector<8x256xf32> to vector<8x64xf32>
    %285 = math.tanh %284 : vector<8x64xf32>
    %286 = vector.extract_strided_slice %271 {offsets = [0, 192], sizes = [8, 64], strides = [1, 1]} : vector<8x256xf32> to vector<8x64xf32>
    %287 = arith.negf %286 : vector<8x64xf32>
    %288 = math.exp %287 : vector<8x64xf32>
    %cst_135 = arith.constant 1.000000e+00 : f32
    %289 = vector.broadcast %cst_135 : f32 to vector<8x64xf32>
    %290 = arith.addf %289, %288 : vector<8x64xf32>
    %291 = arith.divf %289, %290 : vector<8x64xf32>
    %292 = arith.mulf %283, %232 : vector<8x64xf32>
    %293 = arith.mulf %277, %285 : vector<8x64xf32>
    %294 = arith.addf %292, %293 : vector<8x64xf32>
    %295 = math.tanh %294 : vector<8x64xf32>
    %296 = arith.mulf %291, %295 : vector<8x64xf32>
    %c16 = arith.constant 16 : index
    %c0_136 = arith.constant 0 : index
    %297 = vector.load %arg17[%c16, %c0_136] : memref<32x64xf32, #tpu.memory_space<vmem>>, vector<8x64xf32>
    tpu.vector_store %arg17[%c16, %c0_136], %296 {strides = array<i32>} : memref<32x64xf32, #tpu.memory_space<vmem>>, vector<8x64xf32>,
    %c3_137 = arith.constant 3 : index
    %c0_138 = arith.constant 0 : index
    %298 = tpu.strided_load %arg16[%c3_137, %c0_138] {strides = array<i32: 4, 1>} : memref<32x128xf32, #tpu.memory_space<vmem>>, vector<8x128xf32>
    %c0_139 = arith.constant 0 : index
    %c0_140 = arith.constant 0 : index
    %299 = vector.load %arg5[%c0_139, %c0_140] : memref<32x128xf32, #tpu.memory_space<vmem>>, vector<32x128xf32>
    %cst_141 = arith.constant dense<0.000000e+00> : vector<8x128xf32>
    %300 = tpu.matmul %264, %299, %cst_141 {dimension_numbers = #tpu.dot_dimension_numbers<[1], [0], [0], [1], [0, 0, 1, 1], [], []>} : vector<8x32xf32>, vector<32x128xf32>, vector<8x128xf32> -> vector<8x128xf32>
    %301 = arith.addf %298, %300 : vector<8x128xf32>
    %302 = vector.extract_strided_slice %301 {offsets = [0, 0], sizes = [8, 32], strides = [1, 1]} : vector<8x128xf32> to vector<8x32xf32>
    %303 = arith.negf %302 : vector<8x32xf32>
    %304 = math.exp %303 : vector<8x32xf32>
    %cst_142 = arith.constant 1.000000e+00 : f32
    %305 = vector.broadcast %cst_142 : f32 to vector<8x32xf32>
    %306 = arith.addf %305, %304 : vector<8x32xf32>
    %307 = arith.divf %305, %306 : vector<8x32xf32>
    %308 = vector.extract_strided_slice %301 {offsets = [0, 32], sizes = [8, 32], strides = [1, 1]} : vector<8x128xf32> to vector<8x32xf32>
    %309 = arith.negf %308 : vector<8x32xf32>
    %310 = math.exp %309 : vector<8x32xf32>
    %cst_143 = arith.constant 1.000000e+00 : f32
    %311 = vector.broadcast %cst_143 : f32 to vector<8x32xf32>
    %312 = arith.addf %311, %310 : vector<8x32xf32>
    %313 = arith.divf %311, %312 : vector<8x32xf32>
    %314 = vector.extract_strided_slice %301 {offsets = [0, 64], sizes = [8, 32], strides = [1, 1]} : vector<8x128xf32> to vector<8x32xf32>
    %315 = math.tanh %314 : vector<8x32xf32>
    %316 = vector.extract_strided_slice %301 {offsets = [0, 96], sizes = [8, 32], strides = [1, 1]} : vector<8x128xf32> to vector<8x32xf32>
    %317 = arith.negf %316 : vector<8x32xf32>
    %318 = math.exp %317 : vector<8x32xf32>
    %cst_144 = arith.constant 1.000000e+00 : f32
    %319 = vector.broadcast %cst_144 : f32 to vector<8x32xf32>
    %320 = arith.addf %319, %318 : vector<8x32xf32>
    %321 = arith.divf %319, %320 : vector<8x32xf32>
    %322 = arith.mulf %313, %262 : vector<8x32xf32>
    %323 = arith.mulf %307, %315 : vector<8x32xf32>
    %324 = arith.addf %322, %323 : vector<8x32xf32>
    %325 = math.tanh %324 : vector<8x32xf32>
    %326 = arith.mulf %321, %325 : vector<8x32xf32>
    %c0_145 = arith.constant 0 : index
    %c0_146 = arith.constant 0 : index
    %327 = vector.load %arg6[%c0_145, %c0_146] : memref<32x256xf32, #tpu.memory_space<vmem>>, vector<32x256xf32>
    %cst_147 = arith.constant dense<0.000000e+00> : vector<8x256xf32>
    %328 = tpu.matmul %326, %327, %cst_147 {dimension_numbers = #tpu.dot_dimension_numbers<[1], [0], [0], [1], [0, 0, 1, 1], [], []>} : vector<8x32xf32>, vector<32x256xf32>, vector<8x256xf32> -> vector<8x256xf32>
    %329 = vector.broadcast %3 : vector<1x256xf32> to vector<8x256xf32>
    %330 = arith.addf %328, %329 : vector<8x256xf32>
    %c0_148 = arith.constant 0 : index
    %c0_149 = arith.constant 0 : index
    %331 = vector.load %arg7[%c0_148, %c0_149] : memref<64x256xf32, #tpu.memory_space<vmem>>, vector<64x256xf32>
    %cst_150 = arith.constant dense<0.000000e+00> : vector<8x256xf32>
    %332 = tpu.matmul %296, %331, %cst_150 {dimension_numbers = #tpu.dot_dimension_numbers<[1], [0], [0], [1], [0, 0, 1, 1], [], []>} : vector<8x64xf32>, vector<64x256xf32>, vector<8x256xf32> -> vector<8x256xf32>
    %333 = arith.addf %330, %332 : vector<8x256xf32>
    %334 = vector.extract_strided_slice %333 {offsets = [0, 0], sizes = [8, 64], strides = [1, 1]} : vector<8x256xf32> to vector<8x64xf32>
    %335 = arith.negf %334 : vector<8x64xf32>
    %336 = math.exp %335 : vector<8x64xf32>
    %cst_151 = arith.constant 1.000000e+00 : f32
    %337 = vector.broadcast %cst_151 : f32 to vector<8x64xf32>
    %338 = arith.addf %337, %336 : vector<8x64xf32>
    %339 = arith.divf %337, %338 : vector<8x64xf32>
    %340 = vector.extract_strided_slice %333 {offsets = [0, 64], sizes = [8, 64], strides = [1, 1]} : vector<8x256xf32> to vector<8x64xf32>
    %341 = arith.negf %340 : vector<8x64xf32>
    %342 = math.exp %341 : vector<8x64xf32>
    %cst_152 = arith.constant 1.000000e+00 : f32
    %343 = vector.broadcast %cst_152 : f32 to vector<8x64xf32>
    %344 = arith.addf %343, %342 : vector<8x64xf32>
    %345 = arith.divf %343, %344 : vector<8x64xf32>
    %346 = vector.extract_strided_slice %333 {offsets = [0, 128], sizes = [8, 64], strides = [1, 1]} : vector<8x256xf32> to vector<8x64xf32>
    %347 = math.tanh %346 : vector<8x64xf32>
    %348 = vector.extract_strided_slice %333 {offsets = [0, 192], sizes = [8, 64], strides = [1, 1]} : vector<8x256xf32> to vector<8x64xf32>
    %349 = arith.negf %348 : vector<8x64xf32>
    %350 = math.exp %349 : vector<8x64xf32>
    %cst_153 = arith.constant 1.000000e+00 : f32
    %351 = vector.broadcast %cst_153 : f32 to vector<8x64xf32>
    %352 = arith.addf %351, %350 : vector<8x64xf32>
    %353 = arith.divf %351, %352 : vector<8x64xf32>
    %354 = arith.mulf %345, %294 : vector<8x64xf32>
    %355 = arith.mulf %339, %347 : vector<8x64xf32>
    %356 = arith.addf %354, %355 : vector<8x64xf32>
    %357 = math.tanh %356 : vector<8x64xf32>
    %358 = arith.mulf %353, %357 : vector<8x64xf32>
    %c24 = arith.constant 24 : index
    %c0_154 = arith.constant 0 : index
    %359 = vector.load %arg17[%c24, %c0_154] : memref<32x64xf32, #tpu.memory_space<vmem>>, vector<8x64xf32>
    tpu.vector_store %arg17[%c24, %c0_154], %358 {strides = array<i32>} : memref<32x64xf32, #tpu.memory_space<vmem>>, vector<8x64xf32>,
    %c0_155 = arith.constant 0 : index
    %c0_156 = arith.constant 0 : index
    %360 = vector.load %arg8[%c0_155, %c0_156] : memref<64x64xf32, #tpu.memory_space<vmem>>, vector<64x64xf32>
    %cst_157 = arith.constant dense<0.000000e+00> : vector<8x64xf32>
    %361 = tpu.matmul %356, %360, %cst_157 {dimension_numbers = #tpu.dot_dimension_numbers<[1], [0], [0], [1], [0, 0, 1, 1], [], []>} : vector<8x64xf32>, vector<64x64xf32>, vector<8x64xf32> -> vector<8x64xf32>
    %362 = vector.broadcast %4 : vector<1x64xf32> to vector<8x64xf32>
    %363 = arith.addf %361, %362 : vector<8x64xf32>
    %c0_158 = arith.constant 0 : index
    %c0_159 = arith.constant 0 : index
    %364 = vector.load %arg17[%c0_158, %c0_159] : memref<32x64xf32, #tpu.memory_space<vmem>>, vector<8x64xf32>
    %c0_160 = arith.constant 0 : index
    %c0_161 = arith.constant 0 : index
    %365 = vector.load %arg9[%c0_160, %c0_161] : memref<64x64xf32, #tpu.memory_space<vmem>>, vector<64x64xf32>
    %cst_162 = arith.constant dense<0.000000e+00> : vector<8x64xf32>
    %366 = tpu.matmul %364, %365, %cst_162 {dimension_numbers = #tpu.dot_dimension_numbers<[1], [0], [0], [1], [0, 0, 1, 1], [], []>} : vector<8x64xf32>, vector<64x64xf32>, vector<8x64xf32> -> vector<8x64xf32>
    %367 = arith.addf %366, %363 : vector<8x64xf32>
    %368 = math.tanh %367 : vector<8x64xf32>
    %369 = vector.broadcast %5 : vector<1x64xf32> to vector<8x64xf32>
    %370 = arith.mulf %368, %369 : vector<8x64xf32>
    %cst_163 = arith.constant dense<0.000000e+00> : vector<8xf32>
    %371 = vector.multi_reduction <add>, %370, %cst_163 [1] : vector<8x64xf32> to vector<8xf32>
    %372 = vector.shape_cast %371 : vector<8xf32> to vector<8x1xf32>
    %c8_164 = arith.constant 8 : index
    %c0_165 = arith.constant 0 : index
    %373 = vector.load %arg17[%c8_164, %c0_165] : memref<32x64xf32, #tpu.memory_space<vmem>>, vector<8x64xf32>
    %c0_166 = arith.constant 0 : index
    %c0_167 = arith.constant 0 : index
    %374 = vector.load %arg9[%c0_166, %c0_167] : memref<64x64xf32, #tpu.memory_space<vmem>>, vector<64x64xf32>
    %cst_168 = arith.constant dense<0.000000e+00> : vector<8x64xf32>
    %375 = tpu.matmul %373, %374, %cst_168 {dimension_numbers = #tpu.dot_dimension_numbers<[1], [0], [0], [1], [0, 0, 1, 1], [], []>} : vector<8x64xf32>, vector<64x64xf32>, vector<8x64xf32> -> vector<8x64xf32>
    %376 = arith.addf %375, %363 : vector<8x64xf32>
    %377 = math.tanh %376 : vector<8x64xf32>
    %378 = vector.broadcast %5 : vector<1x64xf32> to vector<8x64xf32>
    %379 = arith.mulf %377, %378 : vector<8x64xf32>
    %cst_169 = arith.constant dense<0.000000e+00> : vector<8xf32>
    %380 = vector.multi_reduction <add>, %379, %cst_169 [1] : vector<8x64xf32> to vector<8xf32>
    %381 = vector.shape_cast %380 : vector<8xf32> to vector<8x1xf32>
    %c16_170 = arith.constant 16 : index
    %c0_171 = arith.constant 0 : index
    %382 = vector.load %arg17[%c16_170, %c0_171] : memref<32x64xf32, #tpu.memory_space<vmem>>, vector<8x64xf32>
    %c0_172 = arith.constant 0 : index
    %c0_173 = arith.constant 0 : index
    %383 = vector.load %arg9[%c0_172, %c0_173] : memref<64x64xf32, #tpu.memory_space<vmem>>, vector<64x64xf32>
    %cst_174 = arith.constant dense<0.000000e+00> : vector<8x64xf32>
    %384 = tpu.matmul %382, %383, %cst_174 {dimension_numbers = #tpu.dot_dimension_numbers<[1], [0], [0], [1], [0, 0, 1, 1], [], []>} : vector<8x64xf32>, vector<64x64xf32>, vector<8x64xf32> -> vector<8x64xf32>
    %385 = arith.addf %384, %363 : vector<8x64xf32>
    %386 = math.tanh %385 : vector<8x64xf32>
    %387 = vector.broadcast %5 : vector<1x64xf32> to vector<8x64xf32>
    %388 = arith.mulf %386, %387 : vector<8x64xf32>
    %cst_175 = arith.constant dense<0.000000e+00> : vector<8xf32>
    %389 = vector.multi_reduction <add>, %388, %cst_175 [1] : vector<8x64xf32> to vector<8xf32>
    %390 = vector.shape_cast %389 : vector<8xf32> to vector<8x1xf32>
    %c24_176 = arith.constant 24 : index
    %c0_177 = arith.constant 0 : index
    %391 = vector.load %arg17[%c24_176, %c0_177] : memref<32x64xf32, #tpu.memory_space<vmem>>, vector<8x64xf32>
    %c0_178 = arith.constant 0 : index
    %c0_179 = arith.constant 0 : index
    %392 = vector.load %arg9[%c0_178, %c0_179] : memref<64x64xf32, #tpu.memory_space<vmem>>, vector<64x64xf32>
    %cst_180 = arith.constant dense<0.000000e+00> : vector<8x64xf32>
    %393 = tpu.matmul %391, %392, %cst_180 {dimension_numbers = #tpu.dot_dimension_numbers<[1], [0], [0], [1], [0, 0, 1, 1], [], []>} : vector<8x64xf32>, vector<64x64xf32>, vector<8x64xf32> -> vector<8x64xf32>
    %394 = arith.addf %393, %363 : vector<8x64xf32>
    %395 = math.tanh %394 : vector<8x64xf32>
    %396 = vector.broadcast %5 : vector<1x64xf32> to vector<8x64xf32>
    %397 = arith.mulf %395, %396 : vector<8x64xf32>
    %cst_181 = arith.constant dense<0.000000e+00> : vector<8xf32>
    %398 = vector.multi_reduction <add>, %397, %cst_181 [1] : vector<8x64xf32> to vector<8xf32>
    %399 = vector.shape_cast %398 : vector<8xf32> to vector<8x1xf32>
    %400 = arith.maximumf %372, %381 : vector<8x1xf32>
    %401 = arith.maximumf %400, %390 : vector<8x1xf32>
    %402 = arith.maximumf %401, %399 : vector<8x1xf32>
    %403 = arith.subf %372, %402 : vector<8x1xf32>
    %404 = math.exp %403 : vector<8x1xf32>
    %405 = arith.subf %381, %402 : vector<8x1xf32>
    %406 = math.exp %405 : vector<8x1xf32>
    %407 = arith.subf %390, %402 : vector<8x1xf32>
    %408 = math.exp %407 : vector<8x1xf32>
    %409 = arith.subf %399, %402 : vector<8x1xf32>
    %410 = math.exp %409 : vector<8x1xf32>
    %411 = arith.addf %404, %406 : vector<8x1xf32>
    %412 = arith.addf %411, %408 : vector<8x1xf32>
    %413 = arith.addf %412, %410 : vector<8x1xf32>
    %cst_182 = arith.constant 0.000000e+00 : f32
    %414 = vector.broadcast %cst_182 : f32 to vector<8x64xf32>
    %415 = arith.divf %404, %413 : vector<8x1xf32>
    %c0_183 = arith.constant 0 : index
    %c0_184 = arith.constant 0 : index
    %416 = vector.load %arg17[%c0_183, %c0_184] : memref<32x64xf32, #tpu.memory_space<vmem>>, vector<8x64xf32>
    %417 = vector.broadcast %415 : vector<8x1xf32> to vector<8x64xf32>
    %418 = arith.mulf %417, %416 : vector<8x64xf32>
    %419 = arith.addf %414, %418 : vector<8x64xf32>
    %420 = arith.divf %406, %413 : vector<8x1xf32>
    %c8_185 = arith.constant 8 : index
    %c0_186 = arith.constant 0 : index
    %421 = vector.load %arg17[%c8_185, %c0_186] : memref<32x64xf32, #tpu.memory_space<vmem>>, vector<8x64xf32>
    %422 = vector.broadcast %420 : vector<8x1xf32> to vector<8x64xf32>
    %423 = arith.mulf %422, %421 : vector<8x64xf32>
    %424 = arith.addf %419, %423 : vector<8x64xf32>
    %425 = arith.divf %408, %413 : vector<8x1xf32>
    %c16_187 = arith.constant 16 : index
    %c0_188 = arith.constant 0 : index
    %426 = vector.load %arg17[%c16_187, %c0_188] : memref<32x64xf32, #tpu.memory_space<vmem>>, vector<8x64xf32>
    %427 = vector.broadcast %425 : vector<8x1xf32> to vector<8x64xf32>
    %428 = arith.mulf %427, %426 : vector<8x64xf32>
    %429 = arith.addf %424, %428 : vector<8x64xf32>
    %430 = arith.divf %410, %413 : vector<8x1xf32>
    %c24_189 = arith.constant 24 : index
    %c0_190 = arith.constant 0 : index
    %431 = vector.load %arg17[%c24_189, %c0_190] : memref<32x64xf32, #tpu.memory_space<vmem>>, vector<8x64xf32>
    %432 = vector.broadcast %430 : vector<8x1xf32> to vector<8x64xf32>
    %433 = arith.mulf %432, %431 : vector<8x64xf32>
    %434 = arith.addf %429, %433 : vector<8x64xf32>
    %435 = vector.broadcast %6 : vector<1x64xf32> to vector<8x64xf32>
    %436 = arith.mulf %434, %435 : vector<8x64xf32>
    %cst_191 = arith.constant dense<0.000000e+00> : vector<8xf32>
    %437 = vector.multi_reduction <add>, %436, %cst_191 [1] : vector<8x64xf32> to vector<8xf32>
    %438 = vector.shape_cast %437 : vector<8xf32> to vector<8x1xf32>
    %439 = vector.broadcast %7 : vector<1x1xf32> to vector<8x1xf32>
    %440 = arith.addf %438, %439 : vector<8x1xf32>
    %c0_192 = arith.constant 0 : index
    %c0_193 = arith.constant 0 : index
    %441 = vector.load %arg11[%c0_192, %c0_193] : memref<8x1xf32, #tpu.memory_space<vmem>>, vector<8x1xf32>
    tpu.vector_store %arg11[%c0_192, %c0_193], %440 {strides = array<i32>} : memref<8x1xf32, #tpu.memory_space<vmem>>, vector<8x1xf32>,
    return
  }
  func.func @transform_0(%arg0: i32) -> (i32, i32) {
    %c0_i32 = arith.constant 0 : i32
    %c0_i32_0 = arith.constant 0 : i32
    return %arg0, %c0_i32 : i32, i32
  }
  func.func @transform_1(%arg0: i32) -> (i32, i32, i32) {
    %c0_i32 = arith.constant 0 : i32
    %c0_i32_0 = arith.constant 0 : i32
    %c0_i32_1 = arith.constant 0 : i32
    %c0_i32_2 = arith.constant 0 : i32
    return %c0_i32, %c0_i32_0, %c0_i32_1 : i32, i32, i32
  }
  func.func @transform_2(%arg0: i32) -> (i32, i32, i32) {
    %c0_i32 = arith.constant 0 : i32
    %c0_i32_0 = arith.constant 0 : i32
    %c0_i32_1 = arith.constant 0 : i32
    %c0_i32_2 = arith.constant 0 : i32
    return %c0_i32, %c0_i32_0, %c0_i32_1 : i32, i32, i32
  }
  func.func @transform_3(%arg0: i32) -> (i32, i32) {
    %c0_i32 = arith.constant 0 : i32
    %c0_i32_0 = arith.constant 0 : i32
    %c0_i32_1 = arith.constant 0 : i32
    return %c0_i32, %c0_i32_0 : i32, i32
  }
  func.func @transform_4(%arg0: i32) -> (i32, i32) {
    %c0_i32 = arith.constant 0 : i32
    %c0_i32_0 = arith.constant 0 : i32
    %c0_i32_1 = arith.constant 0 : i32
    return %c0_i32, %c0_i32_0 : i32, i32
  }
  func.func @transform_5(%arg0: i32) -> (i32, i32) {
    %c0_i32 = arith.constant 0 : i32
    %c0_i32_0 = arith.constant 0 : i32
    %c0_i32_1 = arith.constant 0 : i32
    return %c0_i32, %c0_i32_0 : i32, i32
  }
  func.func @transform_6(%arg0: i32) -> (i32, i32) {
    %c0_i32 = arith.constant 0 : i32
    %c0_i32_0 = arith.constant 0 : i32
    %c0_i32_1 = arith.constant 0 : i32
    return %c0_i32, %c0_i32_0 : i32, i32
  }
  func.func @transform_7(%arg0: i32) -> (i32, i32) {
    %c0_i32 = arith.constant 0 : i32
    %c0_i32_0 = arith.constant 0 : i32
    %c0_i32_1 = arith.constant 0 : i32
    return %c0_i32, %c0_i32_0 : i32, i32
  }
  func.func @transform_8(%arg0: i32) -> (i32, i32) {
    %c0_i32 = arith.constant 0 : i32
    %c0_i32_0 = arith.constant 0 : i32
    %c0_i32_1 = arith.constant 0 : i32
    return %c0_i32, %c0_i32_0 : i32, i32
  }
  func.func @transform_9(%arg0: i32) -> (i32, i32) {
    %c0_i32 = arith.constant 0 : i32
    %c0_i32_0 = arith.constant 0 : i32
    %c0_i32_1 = arith.constant 0 : i32
    return %c0_i32, %c0_i32_0 : i32, i32
  }
  func.func @transform_10(%arg0: i32) -> (i32, i32) {
    %c0_i32 = arith.constant 0 : i32
    %c0_i32_0 = arith.constant 0 : i32
    return %arg0, %c0_i32 : i32, i32
  }
}

</mosaic_0001>

<bundles_post_ra>
// kernel: cnn_lstm_attention_forward.1
= control target key start
LH: loop header
LB: loop body
LE: loop exit
PB: predicated region body
PF: predicated region fallthrough
CT: control target
= control target key end

     0   :  { %15 = vsyncpa [#allocation9], 0  ;;  %s5325_s0 = inlined_call_operand.vmem [shape: f32[128,4], index: 0, kind: input, shape index: {}]   ;;  %s5326_s1 = inlined_call_operand.vmem [shape: f32[3,4,16], index: 1, kind: input, shape index: {}]   ;;  %s5327_s2 = inlined_call_operand.hbm [shape: f32[3,16,32], index: 2, kind: input, shape index: {}]   ;;  %s5328_s3 = inlined_call_operand.hbm [shape: f32[32,128], index: 3, kind: input, shape index: {}]   ;;  %s5329_s4 = inlined_call_operand.hbm [shape: f32[32,128], index: 4, kind: input, shape index: {}]   ;;  %s5330_s5 = inlined_call_operand.vmem [shape: f32[32,256], index: 5, kind: input, shape index: {}]   ;;  %s5331_s6 = inlined_call_operand.vmem [shape: f32[64,256], index: 6, kind: input, shape index: {}]   ;;  %s5332_s7 = inlined_call_operand.vmem [shape: f32[64,64], index: 7, kind: input, shape index: {}]   ;;  %s5333_s8 = inlined_call_operand.hbm [shape: f32[64,64], index: 8, kind: input, shape index: {}]   ;;  %s5334_s9 = inlined_call_operand.vmem [shape: f32[8,256], index: 9, kind: input, shape index: {}]   ;;  %s5335_s10 = inlined_call_operand.vmem [shape: f32[8,1], index: 10, kind: output, shape index: {}]  }
   0x1   :  { %16 = vsyncpa [#allocation11], 0 }
   0x2   :  { %17 = vsyncpa [#allocation14], 0  ;;  %s4528_s13 = smov [#allocation10]   ;;  %s4529_s15 = smov [#allocation8]  }
   0x3   :  { %s39_s14 = sshll.u32 %s4528_s13, 4  ;;  %s27_s16 = sshll.u32 %s4529_s15, 4  ;;  %s40_s14 = int_to_ptr.vmem [resolvable:$true] %s39_s14  ;;  %s4594_s16 = int_to_ptr.vmem [resolvable:$true] %s27_s16 }
   0x4   :  { %s4434_s19 = scalar_lea.hbm %s5328_s3, 512 }
   0x5   :  { %p4435_p0 = scmp.ne.s32.totalorder %s5328_s3, %s4434_s19  ;;  %p4438_p1 = scmp.lt.u32.totalorder %s4434_s19, %s5328_s3 }
   0x7   :  { %p4440_p2 = pnand %p4438_p1, %p4435_p0 }
   0x9   :  { %4443 = shalt.err (!%p4440_p2)
}
   0xa   :  { %s4444_s24 = scalar_lea.vmem %s40_s14, 512  ;;  %p4449_p4 = scmp.lt.s32.totalorder %s40_s14, %s40_s14 }
   0xb   :  { %p4445_p3 = scmp.ne.s32.totalorder %s40_s14, %s4444_s24  ;;  %p4450_p5 = scmp.lt.s32.totalorder %s4444_s24, %s4444_s24 }
   0xd   :  { %p4451_p6 = por %p4450_p5, %p4449_p4 }
   0xf   :  { %p4452_p7 = pnand %p4451_p6, %p4445_p3 }
  0x11   :  { %4455 = shalt.err (!%p4452_p7)
}
  0x12   :  { %s4530_s25 = smov 128   ;;  %s4531_s26 = smov 8  }
  0x13   :  { %45 = dma.hbm_to_vmem [thread:$0]  %s5328_s3, 512, %s40_s14, [#allocation11], %s4530_s25, %s4530_s25, %s4531_s26  }
  0x14   :  { %s4456_s11 = scalar_lea.hbm %s5327_s2, 768 }
  0x15   :  { %p4457_p8 = scmp.ne.s32.totalorder %s5327_s2, %s4456_s11  ;;  %p4460_p9 = scmp.lt.u32.totalorder %s4456_s11, %s5327_s2 }
  0x17   :  { %p4462_p10 = pnand %p4460_p9, %p4457_p8 }
  0x19   :  { %4465 = shalt.err (!%p4462_p10)
}
  0x1a   :  { %s4466_s18 = scalar_lea.vmem %s4594_s16, 768  ;;  %p4471_p12 = scmp.lt.s32.totalorder %s4594_s16, %s4594_s16 }
  0x1b   :  { %p4467_p11 = scmp.ne.s32.totalorder %s4594_s16, %s4466_s18  ;;  %p4472_p13 = scmp.lt.s32.totalorder %s4466_s18, %s4466_s18 }
  0x1d   :  { %p4473_p0 = por %p4472_p13, %p4471_p12 }
  0x1f   :  { %p4474_p1 = pnand %p4473_p0, %p4467_p11 }
  0x21   :  { %4477 = shalt.err (!%p4474_p1)
}
  0x22   :  { %33 = dma.hbm_to_vmem [thread:$0]  %s5327_s2, 768, %s4594_s16, [#allocation9], %s4530_s25, %s4530_s25, %s4531_s26  }
  0x23   :  { %s4532_s19 = smov [#allocation12]   ;;  %s4533_s21 = smov [#allocation13]  }
  0x24   :  { %s51_s20 = sshll.u32 %s4532_s19, 4  ;;  %s69_s22 = sshll.u32 %s4533_s21, 4  ;;  %s52_s20 = int_to_ptr.vmem [resolvable:$true] %s51_s20  ;;  %s4631_s22 = int_to_ptr.vmem [resolvable:$true] %s69_s22 }
  0x25   :  { %s4478_s27 = scalar_lea.hbm %s5329_s4, 512 }
  0x26   :  { %p4479_p2 = scmp.ne.s32.totalorder %s5329_s4, %s4478_s27  ;;  %p4482_p3 = scmp.lt.u32.totalorder %s4478_s27, %s5329_s4 }
  0x28   :  { %p4484_p4 = pnand %p4482_p3, %p4479_p2 }
  0x2a   :  { %4487 = shalt.err (!%p4484_p4)
}
  0x2b   :  { %s4488_s2 = scalar_lea.vmem %s52_s20, 512  ;;  %p4493_p6 = scmp.lt.s32.totalorder %s52_s20, %s52_s20 }
  0x2c   :  { %p4489_p5 = scmp.ne.s32.totalorder %s52_s20, %s4488_s2  ;;  %p4494_p7 = scmp.lt.s32.totalorder %s4488_s2, %s4488_s2 }
  0x2e   :  { %p4495_p8 = por %p4494_p7, %p4493_p6 }
  0x30   :  { %p4496_p9 = pnand %p4495_p8, %p4489_p5 }
  0x32   :  { %4499 = shalt.err (!%p4496_p9)
}
  0x33   :  { %57 = dma.hbm_to_vmem [thread:$0]  %s5329_s4, 512, %s52_s20, [#allocation11], %s4530_s25, %s4530_s25, %s4531_s26  }
  0x34   :  { %s4500_s17 = scalar_lea.hbm %s5333_s8, 1024 }
  0x35   :  { %p4501_p10 = scmp.ne.s32.totalorder %s5333_s8, %s4500_s17  ;;  %p4504_p11 = scmp.lt.u32.totalorder %s4500_s17, %s5333_s8 }
  0x37   :  { %p4506_p12 = pnand %p4504_p11, %p4501_p10 }
  0x39   :  { %4509 = shalt.err (!%p4506_p12)
}
  0x3a   :  { %s4510_s21 = scalar_lea.vmem %s4631_s22, 1024  ;;  %p4515_p0 = scmp.lt.s32.totalorder %s4631_s22, %s4631_s22 }
  0x3b   :  { %p4511_p13 = scmp.ne.s32.totalorder %s4631_s22, %s4510_s21  ;;  %p4516_p1 = scmp.lt.s32.totalorder %s4510_s21, %s4510_s21 }
  0x3d   :  { %p4517_p2 = por %p4516_p1, %p4515_p0 }
  0x3f   :  { %p4518_p3 = pnand %p4517_p2, %p4511_p13 }
  0x41   :  { %4521 = shalt.err (!%p4518_p3)
}
  0x42   :  { %75 = dma.hbm_to_vmem [thread:$0]  %s5333_s8, 1024, %s4631_s22, [#allocation14], %s4530_s25, %s4530_s25, %s4531_s26  }
  0x43   :  { %4522 = dma.done.wait [#allocation9], 768  }
  0x44   :  { %4523 = vsyncadd [#allocation9], 4294966528 }
  0x45   :  { %4524 = dma.done.wait [#allocation11], 1024  }
  0x46   :  { %4525 = vsyncadd [#allocation11], 4294966272 }
  0x47   :  { %4526 = dma.done.wait [#allocation14], 1024  }
  0x48   :  { %4527 = vsyncadd [#allocation14], 4294966272  ;;  %vm488_vm0 = vcmask 1043456   ;;  %vm115_vm1 = vcmask 31744   ;;  %v3518_v0 = vld [vmem:[%s5326_s1 + $0x4] sm:$0xf]  ;;  %v164_v19 = vlaneseq }
  0x49   :  { %v99_v1 = vld [vmem:[%s5325_s0] sm:$0xff]  ;;  %v100_v2 = vld [vmem:[%s5325_s0 + $0x8] sm:$0xff]  ;;  %3780 = vmatprep.subr.msk.mxu0 %vm488_vm0, %v3518_v0  ;;  %v101_v4 = vld [vmem:[%s5325_s0 + $0x10] sm:$0xff]  ;;  %4259 = vmatprep.subr.msk.mxu1 %vm488_vm0, %v3518_v0  ;;  %s4537_s3 = smov 64   ;;  %s4538_s14 = smov 32  }
  0x4a   :  { %116 = vst.msk [vmem:[#allocation2 + $0x1] sm:$0xff] %vm115_vm1, %v99_v1  ;;  %3782 = vmatprep.mubr.msk.f32.mxu0 %vm115_vm1, %v99_v1  ;;  %117 = vst.msk [vmem:[#allocation2 + $0x9] sm:$0xff] %vm115_vm1, %v100_v2  ;;  %v437_v3 = vld [vmem:[%s5326_s1] sm:$0xf]  ;;  %v102_v5 = vld [vmem:[%s5325_s0 + $0x18] sm:$0xff]  ;;  %3781 = vmatpush3.msk.msra.mxu0 %vm488_vm0, %v3518_v0  ;;  %v4757_v20 = vshrl.u32 %v164_v19, 7 }
  0x4b   :  { %118 = vst.msk [vmem:[#allocation2 + $0x11] sm:$0xff] %vm115_vm1, %v101_v4  ;;  %119 = vst.msk [vmem:[#allocation2 + $0x19] sm:$0xff] %vm115_vm1, %v102_v5  ;;  %v103_v6 = vld [vmem:[%s5325_s0 + $0x20] sm:$0xff]  ;;  %v104_v7 = vld [vmem:[%s5325_s0 + $0x28] sm:$0xff]  ;;  %3783 = vmatmul.mubr.msk.f32.vlgmr.msra.gmra.mrb[0].mxu0 %vm115_vm1, %v100_v2  ;;  %3806 = vmatprep.subr.msk.mxu0 %vm488_vm0, %v437_v3 }
  0x4c   :  { %v105_v8 = vld [vmem:[%s5325_s0 + $0x30] sm:$0xff]  ;;  %120 = vst.msk [vmem:[#allocation2 + $0x21] sm:$0xff] %vm115_vm1, %v103_v6  ;;  %121 = vst.msk [vmem:[#allocation2 + $0x29] sm:$0xff] %vm115_vm1, %v104_v7  ;;  %v106_v9 = vld [vmem:[%s5325_s0 + $0x38] sm:$0xff]  ;;  %3807 = vmatpush3.msk.msra.mxu0 %vm488_vm0, %v437_v3  ;;  %3785 = vmatprep.mubr.msk.f32.mxu0 %vm115_vm1, %v101_v4  ;;  %v185_v21 = vand.u32 15, %v4757_v20  ;;  %v4763_v22 = vadd.s32 16, %v4757_v20 }
  0x4d   :  { %122 = vst.msk [vmem:[#allocation2 + $0x31] sm:$0xff] %vm115_vm1, %v105_v8  ;;  %v107_v10 = vld [vmem:[%s5325_s0 + $0x40] sm:$0xff]  ;;  %v108_v11 = vld [vmem:[%s5325_s0 + $0x48] sm:$0xff]  ;;  %123 = vst.msk [vmem:[#allocation2 + $0x39] sm:$0xff] %vm115_vm1, %v106_v9  ;;  %4260 = vmatpush3.msk.msra.mxu1 %vm488_vm0, %v3518_v0  ;;  %v4769_v25 = vadd.s32 32, %v4757_v20  ;;  %v4775_v29 = vadd.s32 48, %v4757_v20 }
  0x4e   :  { %124 = vst.msk [vmem:[#allocation2 + $0x41] sm:$0xff] %vm115_vm1, %v107_v10  ;;  %125 = vst.msk [vmem:[#allocation2 + $0x49] sm:$0xff] %vm115_vm1, %v108_v11  ;;  %v109_v12 = vld [vmem:[%s5325_s0 + $0x50] sm:$0xff]  ;;  %v110_v13 = vld [vmem:[%s5325_s0 + $0x58] sm:$0xff]  ;;  %vm373_vm2 = vcmp.eq.s32.totalorder %v185_v21, 0  ;;  %v199_v24 = vand.u32 15, %v4763_v22 }
  0x4f   :  { %v111_v14 = vld [vmem:[%s5325_s0 + $0x60] sm:$0xff]  ;;  %126 = vst.msk [vmem:[#allocation2 + $0x51] sm:$0xff] %vm115_vm1, %v109_v12  ;;  %127 = vst.msk [vmem:[#allocation2 + $0x59] sm:$0xff] %vm115_vm1, %v110_v13  ;;  %v112_v15 = vld [vmem:[%s5325_s0 + $0x68] sm:$0xff]  ;;  %3786 = vmatmul.mubr.msk.f32.gmra.mrb[2].mxu0 %vm115_vm1, %v102_v5  ;;  %v213_v28 = vand.u32 15, %v4769_v25  ;;  %v227_v33 = vand.u32 15, %v4775_v29 }
  0x50   :  { %128 = vst.msk [vmem:[#allocation2 + $0x61] sm:$0xff] %vm115_vm1, %v111_v14  ;;  %v3553_v16 = vld [vmem:[%s5326_s1 + $0x8] sm:$0xf]  ;;  %v113_v17 = vld [vmem:[%s5325_s0 + $0x70] sm:$0xff]  ;;  %129 = vst.msk [vmem:[#allocation2 + $0x69] sm:$0xff] %vm115_vm1, %v112_v15  ;;  %3788 = vmatprep.mubr.msk.f32.mxu0 %vm115_vm1, %v103_v6  ;;  %vm375_vm3 = vcmp.eq.s32.totalorder %v199_v24, 0 }
  0x51   :  { %3832 = vmatprep.subr.msk.mxu0 %vm488_vm0, %v3553_v16  ;;  %130 = vst.msk [vmem:[#allocation2 + $0x71] sm:$0xff] %vm115_vm1, %v113_v17  ;;  %v114_v18 = vld [vmem:[%s5325_s0 + $0x78] sm:$0xff]  ;;  %3803 = vmatprep.mubr.msk.f32.mxu1 %vm115_vm1, %v113_v17  ;;  %v132_v23 = vld [vmem:[#allocation2] sm:$0xff]  ;;  %v133_v30 = vld [vmem:[#allocation2 + $0x8] sm:$0xff]  ;;  %vm377_vm4 = vcmp.eq.s32.totalorder %v213_v28, 0  ;;  %v173_v34 = vadd.s32 64, %v4757_v20 }
  0x52   :  { %131 = vst.msk [vmem:[#allocation2 + $0x79] sm:$0xff] %vm115_vm1, %v114_v18  ;;  %3804 = vmatmul.mubr.msk.f32.vlgmr.msra.gmra.mrb[0].mxu1 %vm115_vm1, %v114_v18  ;;  %v389_v26 = vsel %vm373_vm2, 0.0, %v132_v23  ;;  %v134_v27 = vld [vmem:[#allocation2 + $0x10] sm:$0xff]  ;;  %v135_v35 = vld [vmem:[#allocation2 + $0x18] sm:$0xff]  ;;  %vm379_vm5 = vcmp.eq.s32.totalorder %v227_v33, 0  ;;  %v175_v39 = vadd.s32 80, %v4757_v20 }
  0x53   :  { %3789 = vmatmul.mubr.msk.f32.gmra.mrb[4].mxu0 %vm115_vm1, %v104_v7  ;;  %v391_v31 = vsel %vm375_vm3, 0.0, %v134_v27  ;;  %v136_v32 = vld [vmem:[#allocation2 + $0x20] sm:$0xff]  ;;  %v241_v38 = vand.u32 15, %v173_v34  ;;  %v137_v40 = vld [vmem:[#allocation2 + $0x28] sm:$0xff]  ;;  %v177_v44 = vadd.s32 96, %v4757_v20  ;;  %v179_v49 = vadd.s32 112, %v4757_v20 }
  0x54   :  { %3791 = vmatprep.mubr.msk.f32.mxu0 %vm115_vm1, %v105_v8  ;;  %v393_v36 = vsel %vm377_vm4, 0.0, %v136_v32  ;;  %v138_v37 = vld [vmem:[#allocation2 + $0x30] sm:$0xff]  ;;  %v255_v43 = vand.u32 15, %v175_v39  ;;  %v139_v45 = vld [vmem:[#allocation2 + $0x38] sm:$0xff]  ;;  %v4796_v56 = vadd.s32 8, %v4757_v20  ;;  %v4802_v61 = vadd.s32 24, %v4757_v20 }
  0x55   :  { %v395_v41 = vsel %vm379_vm5, 0.0, %v138_v37  ;;  %v140_v42 = vld [vmem:[#allocation2 + $0x40] sm:$0xff]  ;;  %vm381_vm6 = vcmp.eq.s32.totalorder %v241_v38, 0  ;;  %v269_v48 = vand.u32 15, %v177_v44  ;;  %v141_v50 = vld [vmem:[#allocation2 + $0x48] sm:$0xff]  ;;  %v283_v53 = vand.u32 15, %v179_v49 }
  0x56   :  { %v397_v46 = vsel %vm381_vm6, 0.0, %v140_v42  ;;  %v142_v47 = vld [vmem:[#allocation2 + $0x50] sm:$0xff]  ;;  %vm383_vm7 = vcmp.eq.s32.totalorder %v255_v43, 0  ;;  %v143_v54 = vld [vmem:[#allocation2 + $0x58] sm:$0xff]  ;;  %v192_v60 = vand.u32 15, %v4796_v56  ;;  %v148_v63 = vld [vmem:[#allocation2 + $0x2] sm:$0xff] }
  0x57   :  { %3792 = vmatmul.mubr.msk.f32.gmra.mrb[6].mxu0 %vm115_vm1, %v106_v9  ;;  %v399_v51 = vsel %vm383_vm7, 0.0, %v142_v47  ;;  %v144_v52 = vld [vmem:[#allocation2 + $0x60] sm:$0xff]  ;;  %vm385_vm8 = vcmp.eq.s32.totalorder %v269_v48, 0  ;;  %vm387_vm9 = vcmp.eq.s32.totalorder %v283_v53, 0  ;;  %v145_v58 = vld [vmem:[#allocation2 + $0x68] sm:$0xff]  ;;  %v206_v1 = vand.u32 15, %v4802_v61 }
  0x58   :  { %3794 = vmatprep.mubr.msk.f32.mxu0 %vm115_vm1, %v107_v10  ;;  %v401_v55 = vsel %vm385_vm8, 0.0, %v144_v52  ;;  %v146_v57 = vld [vmem:[#allocation2 + $0x70] sm:$0xff]  ;;  %vm406_vm10 = vcmp.eq.s32.totalorder %v192_v60, 15  ;;  %v4808_v2 = vadd.s32 40, %v4757_v20  ;;  %v151_v5 = vld [vmem:[#allocation2 + $0x1a] sm:$0xff]  ;;  %v4814_v7 = vadd.s32 56, %v4757_v20 }
  0x59   :  { %v403_v59 = vsel %vm387_vm9, 0.0, %v146_v57  ;;  %v147_v62 = vld [vmem:[#allocation2 + $0x78] sm:$0xff]  ;;  %v149_v0 = vld [vmem:[#allocation2 + $0xa] sm:$0xff]  ;;  %vm408_vm11 = vcmp.eq.s32.totalorder %v206_v1, 15  ;;  %v152_v9 = vld [vmem:[#allocation2 + $0x22] sm:$0xff]  ;;  %v176_v17 = vadd.s32 88, %v4757_v20 }
  0x5a   :  { %v422_v3 = vsel %vm406_vm10, 0.0, %v149_v0  ;;  %v150_v4 = vld [vmem:[#allocation2 + $0x12] sm:$0xff]  ;;  %v220_v6 = vand.u32 15, %v4808_v2  ;;  %v424_v8 = vsel %vm408_vm11, 0.0, %v151_v5  ;;  %v153_v10 = vld [vmem:[#allocation2 + $0x2a] sm:$0xff]  ;;  %v156_v19 = vld [vmem:[#allocation2 + $0x42] sm:$0xff] }
  0x5b   :  { %3795 = vmatmul.mubr.msk.f32.gmra.mrb[8].mxu0 %vm115_vm1, %v108_v11  ;;  %v234_v11 = vand.u32 15, %v4814_v7  ;;  %v157_v21 = vld [vmem:[#allocation2 + $0x4a] sm:$0xff]  ;;  %v262_v23 = vand.u32 15, %v176_v17  ;;  %v178_v24 = vadd.s32 104, %v4757_v20  ;;  %v158_v27 = vld [vmem:[#allocation2 + $0x52] sm:$0xff]  ;;  %v159_v28 = vld [vmem:[#allocation2 + $0x5a] sm:$0xff] }
  0x5c   :  { %3797 = vmatprep.mubr.msk.f32.mxu0 %vm115_vm1, %v109_v12  ;;  %vm410_vm12 = vcmp.eq.s32.totalorder %v220_v6, 15  ;;  %v174_v12 = vadd.s32 72, %v4757_v20  ;;  %v160_v33 = vld [vmem:[#allocation2 + $0x62] sm:$0xff]  ;;  %v161_v34 = vld [vmem:[#allocation2 + $0x6a] sm:$0xff]  ;;  %v162_v37 = vld [vmem:[#allocation2 + $0x72] sm:$0xff] }
  0x5d   :  { %vm412_vm13 = vcmp.eq.s32.totalorder %v234_v11, 15  ;;  %vm416_vm15 = vcmp.eq.s32.totalorder %v262_v23, 15  ;;  %v163_v38 = vld [vmem:[#allocation2 + $0x7a] sm:$0xff]  ;;  %v1287_v43 = vld [vmem:[#allocation8] sm:$0xff] }
  0x5e   :  { %v432_v32 = vsel %vm416_vm15, 0.0, %v159_v28  ;;  %v1288_v44 = vld [vmem:[#allocation8 + $0x8] sm:$0xff]  ;;  %v4843_v48 = vld [vmem:[%s5334_s9] ss:$0 sm:$0xff] }
  0x5f   :  { %3798 = vmatmul.mubr.msk.f32.gmra.mrb[10].mxu0 %vm115_vm1, %v110_v13  ;;  %v426_v13 = vsel %vm410_vm12, 0.0, %v153_v10 }
  0x60   :  { %3800 = vmatprep.mubr.msk.f32.mxu0 %vm115_vm1, %v111_v14  ;;  %v154_v14 = vld [vmem:[#allocation2 + $0x32] sm:$0xff] }
  0x63   :  { %3801 = vmatmul.mubr.msk.f32.gmra.mrb[12].mxu0 %vm115_vm1, %v112_v15  ;;  %v155_v15 = vld [vmem:[#allocation2 + $0x3a] sm:$0xff] }
  0x64   :  { %3808 = vmatprep.mubr.msk.f32.mxu0 %vm115_vm1, %v389_v26  ;;  %v428_v18 = vsel %vm412_vm13, 0.0, %v155_v15  ;;  %v1551_v15 = vld [vmem:[#allocation8 + $0x20] sm:$0xff] }
  0x67   :  { %3809 = vmatmul.mubr.msk.f32.vlgmr.msra.gmra.mrb[0].mxu0 %vm115_vm1, %v133_v30  ;;  %v276_v30 = vand.u32 15, %v178_v24 }
  0x68   :  { %3833 = vmatpush3.msk.msra.mxu0 %vm488_vm0, %v3553_v16  ;;  %3811 = vmatprep.mubr.msk.f32.mxu0 %vm115_vm1, %v391_v31  ;;  %v248_v16 = vand.u32 15, %v174_v12  ;;  %v180_v31 = vadd.s32 120, %v4757_v20 }
  0x69   :  { %vm418_vm0 = vcmp.eq.s32.totalorder %v276_v30, 15 }
  0x6a   :  { %vm414_vm14 = vcmp.eq.s32.totalorder %v248_v16, 15  ;;  %v1552_v16 = vld [vmem:[#allocation8 + $0x28] sm:$0xff] }
  0x6b   :  { %3812 = vmatmul.mubr.msk.f32.gmra.mrb[2].mxu0 %vm115_vm1, %v135_v35  ;;  %v430_v26 = vsel %vm414_vm14, 0.0, %v157_v21  ;;  %v290_v35 = vand.u32 15, %v180_v31  ;;  %v4865_v28 = vpack.c.bf16 %v1552_v16, %v1551_v15  ;;  %v1184_v16 = vand.u32 7, %v4802_v61 }
  0x6c   :  { %3814 = vmatprep.mubr.msk.f32.mxu0 %vm115_vm1, %v393_v36  ;;  %v434_v36 = vsel %vm418_vm0, 0.0, %v161_v34  ;;  %v1205_v61 = vand.u32 7, %v4775_v29 }
  0x6d   :  { %vm420_vm2 = vcmp.eq.s32.totalorder %v290_v35, 15  ;;  %vm1258_vm6 = vcmp.eq.s32.totalorder %v1184_v16, 0  ;;  %vm1274_vm14 = vcmp.eq.s32.totalorder %v1184_v16, 7 }
  0x6e   :  { %v436_v39 = vsel %vm420_vm2, 0.0, %v163_v38  ;;  %vm1261_vm9 = vcmp.eq.s32.totalorder %v1205_v61, 0  ;;  %vm1277_vm2 = vcmp.eq.s32.totalorder %v1205_v61, 7 }
  0x6f   :  { %3815 = vmatmul.mubr.msk.f32.gmra.mrb[4].mxu0 %vm115_vm1, %v137_v40  ;;  %v1290_v40 = vld [vmem:[#allocation8 + $0x10] sm:$0xff] }
  0x70   :  { %3817 = vmatprep.mubr.msk.f32.mxu0 %vm115_vm1, %v395_v41  ;;  %v1291_v41 = vld [vmem:[#allocation8 + $0x18] sm:$0xff] }
  0x71   :  { %v4059_v42 = vpack.c.bf16 %v1291_v41, %v1290_v40 }
  0x73   :  { %3818 = vmatmul.mubr.msk.f32.gmra.mrb[6].mxu0 %vm115_vm1, %v139_v45  ;;  %4060 = vmatprep.subr.bf16.mxu1 %v4059_v42  ;;  %v4063_v45 = vpack.c.bf16 %v1288_v44, %v1287_v43 }
  0x74   :  { %3820 = vmatprep.mubr.msk.f32.mxu0 %vm115_vm1, %v397_v46  ;;  %4062 = vmatpush3.bf16.msra.mxu1 %v4059_v42 }
  0x75   :  { %4064 = vmatprep.subr.bf16.mxu1 %v4063_v45 }
  0x77   :  { %3821 = vmatmul.mubr.msk.f32.gmra.mrb[8].mxu0 %vm115_vm1, %v141_v50 }
  0x78   :  { %3823 = vmatprep.mubr.msk.f32.mxu0 %vm115_vm1, %v399_v51 }
  0x7b   :  { %3824 = vmatmul.mubr.msk.f32.gmra.mrb[10].mxu0 %vm115_vm1, %v143_v54 }
  0x7c   :  { %3826 = vmatprep.mubr.msk.f32.mxu0 %vm115_vm1, %v401_v55 }
  0x7f   :  { %3827 = vmatmul.mubr.msk.f32.gmra.mrb[12].mxu0 %vm115_vm1, %v145_v58 }
  0x80   :  { %3829 = vmatprep.mubr.msk.f32.mxu0 %vm115_vm1, %v403_v59 }
  0x83   :  { %3830 = vmatmul.mubr.msk.f32.gmra.mrb[14].mxu0 %vm115_vm1, %v147_v62 }
  0x84   :  { %3834 = vmatprep.mubr.msk.f32.mxu0 %vm115_vm1, %v148_v63 }
  0x87   :  { %3835 = vmatmul.mubr.msk.f32.vlgmr.msra.gmra.mrb[0].mxu0 %vm115_vm1, %v422_v3 }
  0x88   :  { %3837 = vmatprep.mubr.msk.f32.mxu0 %vm115_vm1, %v150_v4 }
  0x8b   :  { %3838 = vmatmul.mubr.msk.f32.gmra.mrb[2].mxu0 %vm115_vm1, %v424_v8 }
  0x8c   :  { %3840 = vmatprep.mubr.msk.f32.mxu0 %vm115_vm1, %v152_v9 }
  0x8f   :  { %3841 = vmatmul.mubr.msk.f32.gmra.mrb[4].mxu0 %vm115_vm1, %v426_v13 }
  0x90   :  { %3843 = vmatprep.mubr.msk.f32.mxu0 %vm115_vm1, %v154_v14 }
  0x93   :  { %3844 = vmatmul.mubr.msk.f32.gmra.mrb[6].mxu0 %vm115_vm1, %v428_v18 }
  0x94   :  { %3846 = vmatprep.mubr.msk.f32.mxu0 %vm115_vm1, %v156_v19 }
  0x97   :  { %3847 = vmatmul.mubr.msk.f32.gmra.mrb[8].mxu0 %vm115_vm1, %v430_v26 }
  0x98   :  { %3849 = vmatprep.mubr.msk.f32.mxu0 %vm115_vm1, %v158_v27 }
  0x9b   :  { %3850 = vmatmul.mubr.msk.f32.gmra.mrb[10].mxu0 %vm115_vm1, %v432_v32 }
  0x9c   :  { %3852 = vmatprep.mubr.msk.f32.mxu0 %vm115_vm1, %v160_v33 }
  0x9f   :  { %3853 = vmatmul.mubr.msk.f32.gmra.mrb[12].mxu0 %vm115_vm1, %v434_v36 }
  0xa0   :  { %3855 = vmatprep.mubr.msk.f32.mxu0 %vm115_vm1, %v162_v37 }
  0xa3   :  { %3856 = vmatmul.mubr.msk.f32.gmra.mrb[14].mxu0 %vm115_vm1, %v436_v39  ;;  %vm1079_vm1 = vcmask 130048  }
 0x125   :  { %v4836_v46 = vpop.f32.mrb[0].mxu1 }
 0x126   :  { %v4838_v47 = vpop.f32.mrb[1].mxu1 }
 0x15a   :  { %v3836_v49 = vpop.f32.mrb[0].mxu0 }
 0x15b   :  { %v1048_v50 = vadd.f32 %v3836_v49, %v4843_v48  ;;  %v952_v51 = vpop.f32.mrb[1].mxu0 }
 0x15c   :  { %v1047_v52 = vadd.f32 %v952_v51, %v4843_v48 }
 0x15d   :  { %v1064_v53 = vmax.f32 %v1048_v50, 0.0 }
 0x15e   :  { %v1063_v54 = vmax.f32 %v1047_v52, 0.0  ;;  %v3839_v55 = vpop.f32.mrb[2].mxu0 }
 0x15f   :  { %1081 = vst.msk [vmem:[#allocation3 + $0x8] sm:$0xff] %vm1079_vm1, %v1064_v53  ;;  %v1050_v57 = vadd.f32 %v3839_v55, %v4843_v48  ;;  %v962_v58 = vpop.f32.mrb[3].mxu0 }
 0x160   :  { %1080 = vst.msk [vmem:[#allocation3] sm:$0xff] %vm1079_vm1, %v1063_v54  ;;  %v1049_v59 = vadd.f32 %v962_v58, %v4843_v48 }
 0x161   :  { %v1066_v60 = vmax.f32 %v1050_v57, 0.0 }
 0x162   :  { %v1065_v62 = vmax.f32 %v1049_v59, 0.0  ;;  %v3842_v63 = vpop.f32.mrb[4].mxu0 }
 0x163   :  { %1083 = vst.msk [vmem:[#allocation3 + $0x18] sm:$0xff] %vm1079_vm1, %v1066_v60  ;;  %v1052_v0 = vadd.f32 %v3842_v63, %v4843_v48  ;;  %v972_v1 = vpop.f32.mrb[5].mxu0 }
 0x164   :  { %1082 = vst.msk [vmem:[#allocation3 + $0x10] sm:$0xff] %vm1079_vm1, %v1065_v62  ;;  %v1051_v3 = vadd.f32 %v972_v1, %v4843_v48 }
 0x165   :  { %v1068_v4 = vmax.f32 %v1052_v0, 0.0 }
 0x166   :  { %v1067_v5 = vmax.f32 %v1051_v3, 0.0  ;;  %v3845_v6 = vpop.f32.mrb[6].mxu0 }
 0x167   :  { %1085 = vst.msk [vmem:[#allocation3 + $0x28] sm:$0xff] %vm1079_vm1, %v1068_v4  ;;  %v1054_v8 = vadd.f32 %v3845_v6, %v4843_v48  ;;  %v982_v9 = vpop.f32.mrb[7].mxu0  ;;  %v1096_v10 = vld [vmem:[#allocation3] ss:$2 sm:$0xff]  ;;  %v1112_v11 = vld [vmem:[#allocation3 + $0x1] ss:$2 sm:$0xff] }
 0x168   :  { %1084 = vst.msk [vmem:[#allocation3 + $0x20] sm:$0xff] %vm1079_vm1, %v1067_v5  ;;  %v1053_v12 = vadd.f32 %v982_v9, %v4843_v48  ;;  %v1127_v13 = vmax.f32 %v1096_v10, %v1112_v11  ;;  %v1163_v6 = vand.u32 7, %v4757_v20 }
 0x169   :  { %v1070_v14 = vmax.f32 %v1054_v8, 0.0  ;;  %v1170_v8 = vand.u32 7, %v4796_v56  ;;  %v1191_v56 = vand.u32 7, %v4769_v25 }
 0x16a   :  { %v1069_v17 = vmax.f32 %v1053_v12, 0.0  ;;  %v3848_v18 = vpop.f32.mrb[8].mxu0  ;;  %1135 = vst.msk [vmem:[#allocation4 + $0x1] sm:$0xff] %vm1079_vm1, %v1127_v13  ;;  %3862 = vmatprep.mubr.msk.f32.mxu1 %vm1079_vm1, %v1127_v13  ;;  %vm1255_vm3 = vcmp.eq.s32.totalorder %v1163_v6, 0  ;;  %v1177_v12 = vand.u32 7, %v4763_v22  ;;  %vm1271_vm11 = vcmp.eq.s32.totalorder %v1163_v6, 7 }
 0x16b   :  { %1087 = vst.msk [vmem:[#allocation3 + $0x38] sm:$0xff] %vm1079_vm1, %v1070_v14  ;;  %v1056_v19 = vadd.f32 %v3848_v18, %v4843_v48  ;;  %v992_v21 = vpop.f32.mrb[9].mxu0  ;;  %v1098_v23 = vld [vmem:[#allocation3 + $0x10] ss:$2 sm:$0xff]  ;;  %v1114_v24 = vld [vmem:[#allocation3 + $0x11] ss:$2 sm:$0xff] }
 0x16c   :  { %1086 = vst.msk [vmem:[#allocation3 + $0x30] sm:$0xff] %vm1079_vm1, %v1069_v17  ;;  %v1055_v26 = vadd.f32 %v992_v21, %v4843_v48  ;;  %v1128_v27 = vmax.f32 %v1098_v23, %v1114_v24  ;;  %vm1256_vm4 = vcmp.eq.s32.totalorder %v1170_v8, 0  ;;  %vm1257_vm5 = vcmp.eq.s32.totalorder %v1177_v12, 0 }
 0x16d   :  { %v1072_v30 = vmax.f32 %v1056_v19, 0.0  ;;  %v1198_v21 = vand.u32 7, %v4808_v2  ;;  %vm1259_vm7 = vcmp.eq.s32.totalorder %v1191_v56, 0  ;;  %vm1272_vm12 = vcmp.eq.s32.totalorder %v1170_v8, 7 }
 0x16e   :  { %v1071_v31 = vmax.f32 %v1055_v26, 0.0  ;;  %v3851_v32 = vpop.f32.mrb[10].mxu0  ;;  %1136 = vst.msk [vmem:[#allocation4 + $0x9] sm:$0xff] %vm1079_vm1, %v1128_v27  ;;  %3863 = vmatmul.mubr.msk.f32.vlgmr.msra.gmra.mrb[2].mxu1 %vm1079_vm1, %v1128_v27  ;;  %v1212_v27 = vand.u32 7, %v4814_v7  ;;  %vm1273_vm13 = vcmp.eq.s32.totalorder %v1177_v12, 7  ;;  %vm1275_vm15 = vcmp.eq.s32.totalorder %v1191_v56, 7 }
 0x16f   :  { %1089 = vst.msk [vmem:[#allocation3 + $0x48] sm:$0xff] %vm1079_vm1, %v1072_v30  ;;  %v1058_v33 = vadd.f32 %v3851_v32, %v4843_v48  ;;  %v1002_v34 = vpop.f32.mrb[11].mxu0  ;;  %v1100_v35 = vld [vmem:[#allocation3 + $0x20] ss:$2 sm:$0xff]  ;;  %v1116_v36 = vld [vmem:[#allocation3 + $0x21] ss:$2 sm:$0xff]  ;;  %4066 = vmatpush3.bf16.msra.mxu1 %v4063_v45 }
 0x170   :  { %1088 = vst.msk [vmem:[#allocation3 + $0x40] sm:$0xff] %vm1079_vm1, %v1071_v31  ;;  %v1057_v37 = vadd.f32 %v1002_v34, %v4843_v48  ;;  %v1129_v38 = vmax.f32 %v1100_v35, %v1116_v36  ;;  %4068 = vmatprep.subr.bf16.mxu1 %v4865_v28  ;;  %vm1260_vm8 = vcmp.eq.s32.totalorder %v1198_v21, 0  ;;  %vm1262_vm10 = vcmp.eq.s32.totalorder %v1212_v27, 0 }
 0x171   :  { %v1074_v39 = vmax.f32 %v1058_v33, 0.0  ;;  %v1143_v11 = vld [vmem:[#allocation4] sm:$0xff]  ;;  %vm1276_vm0 = vcmp.eq.s32.totalorder %v1198_v21, 7 }
 0x172   :  { %v1073_v40 = vmax.f32 %v1057_v37, 0.0  ;;  %v3854_v41 = vpop.f32.mrb[12].mxu0  ;;  %1137 = vst.msk [vmem:[#allocation4 + $0x11] sm:$0xff] %vm1079_vm1, %v1129_v38  ;;  %3865 = vmatprep.mubr.msk.f32.mxu1 %vm1079_vm1, %v1129_v38  ;;  %v1263_v14 = vsel %vm1255_vm3, 0.0, %v1143_v11  ;;  %vm1278_vm3 = vcmp.eq.s32.totalorder %v1212_v27, 7  ;;  %v1841_v21 = vld [vmem:[#allocation12 + $0x8] sm:$0xff] }
 0x173   :  { %1091 = vst.msk [vmem:[#allocation3 + $0x58] sm:$0xff] %vm1079_vm1, %v1074_v39  ;;  %v1060_v42 = vadd.f32 %v3854_v41, %v4843_v48  ;;  %v1012_v43 = vpop.f32.mrb[13].mxu0  ;;  %v1102_v44 = vld [vmem:[#allocation3 + $0x30] ss:$2 sm:$0xff]  ;;  %v1118_v45 = vld [vmem:[#allocation3 + $0x31] ss:$2 sm:$0xff] }
 0x174   :  { %1090 = vst.msk [vmem:[#allocation3 + $0x50] sm:$0xff] %vm1079_vm1, %v1073_v40  ;;  %v1059_v49 = vadd.f32 %v1012_v43, %v4843_v48  ;;  %v1130_v50 = vmax.f32 %v1102_v44, %v1118_v45 }
 0x175   :  { %v1076_v51 = vmax.f32 %v1060_v42, 0.0  ;;  %v1144_v15 = vld [vmem:[#allocation4 + $0x8] sm:$0xff] }
 0x176   :  { %v1075_v52 = vmax.f32 %v1059_v49, 0.0  ;;  %v3857_v53 = vpop.f32.mrb[14].mxu0  ;;  %1138 = vst.msk [vmem:[#allocation4 + $0x19] sm:$0xff] %vm1079_vm1, %v1130_v50  ;;  %3866 = vmatmul.mubr.msk.f32.gmra.mrb[4].mxu1 %vm1079_vm1, %v1130_v50  ;;  %v1264_v18 = vsel %vm1256_vm4, 0.0, %v1144_v15  ;;  %v1151_v29 = vld [vmem:[#allocation4 + $0x2] sm:$0xff]  ;;  %v1734_v50 = vld [vmem:[#allocation10] sm:$0xff] }
 0x177   :  { %1093 = vst.msk [vmem:[#allocation3 + $0x68] sm:$0xff] %vm1079_vm1, %v1076_v51  ;;  %v4261_v54 = vadd.f32 %v3857_v53, %v4836_v46  ;;  %v1022_v55 = vpop.f32.mrb[15].mxu0  ;;  %v1104_v57 = vld [vmem:[#allocation3 + $0x40] ss:$2 sm:$0xff]  ;;  %v1120_v58 = vld [vmem:[#allocation3 + $0x41] ss:$2 sm:$0xff] }
 0x178   :  { %1092 = vst.msk [vmem:[#allocation3 + $0x60] sm:$0xff] %vm1079_vm1, %v1075_v52  ;;  %v4262_v59 = vadd.f32 %v1022_v55, %v4838_v47  ;;  %v1131_v60 = vmax.f32 %v1104_v57, %v1120_v58  ;;  %v1279_v33 = vsel %vm1271_vm11, 0.0, %v1151_v29  ;;  %v1735_v51 = vld [vmem:[#allocation10 + $0x8] sm:$0xff]  ;;  %v1736_v53 = vld [vmem:[#allocation10 + $0x10] sm:$0xff]  ;;  %v4534_v57 = vmov 0.0|0.0  }
 0x179   :  { %v1062_v62 = vadd.f32 %v4261_v54, %v4843_v48  ;;  %v1145_v17 = vld [vmem:[#allocation4 + $0x10] sm:$0xff]  ;;  %v4071_v52 = vpack.c.bf16 %v1735_v51, %v1734_v50  ;;  %v4535_v58 = vmov 0.0   ;;  %vm4536_vm4 = vmmov 0  }
 0x17a   :  { %v1061_v63 = vadd.f32 %v4262_v59, %v4843_v48  ;;  %1139 = vst.msk [vmem:[#allocation4 + $0x21] sm:$0xff] %vm1079_vm1, %v1131_v60  ;;  %3868 = vmatprep.mubr.msk.f32.mxu1 %vm1079_vm1, %v1131_v60  ;;  %v1265_v22 = vsel %vm1257_vm5, 0.0, %v1145_v17  ;;  %v1152_v34 = vld [vmem:[#allocation4 + $0xa] sm:$0xff]  ;;  %2334 = vmatprep.mubr.f32.mxu0 %v4535_v58  ;;  %v91_v59 = vld [vmem:[%s5334_s9 + $0x1] ss:$0 sm:$0xff]  ;;  %vm2053_vm5 = vcmask 523264  }
 0x17b   :  { %v1078_v0 = vmax.f32 %v1062_v62, 0.0  ;;  %v1106_v1 = vld [vmem:[#allocation3 + $0x50] ss:$2 sm:$0xff]  ;;  %v1122_v3 = vld [vmem:[#allocation3 + $0x51] ss:$2 sm:$0xff]  ;;  %v1280_v35 = vsel %vm1272_vm12, 0.0, %v1152_v34 }
 0x17c   :  { %v1077_v46 = vmax.f32 %v1061_v63, 0.0  ;;  %v1132_v4 = vmax.f32 %v1106_v1, %v1122_v3  ;;  %v1737_v54 = vld [vmem:[#allocation10 + $0x18] sm:$0xff] }
 0x17d   :  { %1095 = vst.msk [vmem:[#allocation3 + $0x78] sm:$0xff] %vm1079_vm1, %v1078_v0  ;;  %v1146_v19 = vld [vmem:[#allocation4 + $0x18] sm:$0xff]  ;;  %v4075_v55 = vpack.c.bf16 %v1737_v54, %v1736_v53 }
 0x17e   :  { %1094 = vst.msk [vmem:[#allocation3 + $0x70] sm:$0xff] %vm1079_vm1, %v1077_v46  ;;  %1140 = vst.msk [vmem:[#allocation4 + $0x29] sm:$0xff] %vm1079_vm1, %v1132_v4  ;;  %3869 = vmatmul.mubr.msk.f32.gmra.mrb[6].mxu1 %vm1079_vm1, %v1132_v4  ;;  %v1266_v24 = vsel %vm1258_vm6, 0.0, %v1146_v19  ;;  %v1153_v7 = vld [vmem:[#allocation4 + $0x12] sm:$0xff]  ;;  %vm3508_vm6 = vcmask 7168  }
 0x17f   :  { %v1108_v47 = vld [vmem:[#allocation3 + $0x60] ss:$2 sm:$0xff]  ;;  %v1124_v5 = vld [vmem:[#allocation3 + $0x61] ss:$2 sm:$0xff]  ;;  %v1281_v36 = vsel %vm1273_vm13, 0.0, %v1153_v7  ;;  %v1840_v19 = vld [vmem:[#allocation12] sm:$0xff] }
 0x180   :  { %v1133_v48 = vmax.f32 %v1108_v47, %v1124_v5 }
 0x181   :  { %v1147_v23 = vld [vmem:[#allocation4 + $0x20] sm:$0xff] }
 0x182   :  { %1141 = vst.msk [vmem:[#allocation4 + $0x31] sm:$0xff] %vm1079_vm1, %v1133_v48  ;;  %3871 = vmatprep.mubr.msk.f32.mxu1 %vm1079_vm1, %v1133_v48  ;;  %v1267_v25 = vsel %vm1259_vm7, 0.0, %v1147_v23  ;;  %v1154_v37 = vld [vmem:[#allocation4 + $0x1a] sm:$0xff] }
 0x183   :  { %v1282_v39 = vsel %vm1274_vm14, 0.0, %v1154_v37 }
 0x185   :  { %v1110_v9 = vld [vmem:[#allocation3 + $0x70] ss:$2 sm:$0xff]  ;;  %v1126_v10 = vld [vmem:[#allocation3 + $0x71] ss:$2 sm:$0xff]  ;;  %v1148_v26 = vld [vmem:[#allocation4 + $0x28] sm:$0xff] }
 0x186   :  { %v1134_v13 = vmax.f32 %v1110_v9, %v1126_v10  ;;  %v1268_v2 = vsel %vm1260_vm8, 0.0, %v1148_v26  ;;  %v1155_v38 = vld [vmem:[#allocation4 + $0x22] sm:$0xff]  ;;  %v4936_v26 = vpack.c.bf16 %v1841_v21, %v1840_v19  ;;  %v2044_v19 = vld [vmem:[%s5331_s6 + $0x38] sm:$0xff] }
 0x187   :  { %v1283_v40 = vsel %vm1275_vm15, 0.0, %v1155_v38 }
 0x188   :  { %1142 = vst.msk [vmem:[#allocation4 + $0x39] sm:$0xff] %vm1079_vm1, %v1134_v13  ;;  %3872 = vmatmul.mubr.msk.f32.gmra.mrb[8].mxu1 %vm1079_vm1, %v1134_v13 }
 0x189   :  { %3878 = vmatprep.mubr.msk.f32.mxu1 %vm1079_vm1, %v1263_v14  ;;  %v1149_v30 = vld [vmem:[#allocation4 + $0x30] sm:$0xff] }
 0x18a   :  { %v1156_v41 = vld [vmem:[#allocation4 + $0x2a] sm:$0xff] }
 0x18b   :  { %v1284_v43 = vsel %vm1276_vm0, 0.0, %v1156_v41 }
 0x18c   :  { %3879 = vmatmul.mubr.msk.f32.vlgmr.msra.gmra.mrb[2].mxu1 %vm1079_vm1, %v1264_v18 }
 0x18d   :  { %3881 = vmatprep.mubr.msk.f32.mxu1 %vm1079_vm1, %v1265_v22  ;;  %4070 = vmatpush3.bf16.msra.mxu1 %v4865_v28  ;;  %v1269_v28 = vsel %vm1261_vm9, 0.0, %v1149_v30  ;;  %v1842_v30 = vld [vmem:[#allocation12 + $0x10] sm:$0xff] }
 0x18e   :  { %4072 = vmatprep.subr.bf16.mxu1 %v4071_v52 }
 0x18f   :  { %v1150_v31 = vld [vmem:[#allocation4 + $0x38] sm:$0xff] }
 0x190   :  { %3882 = vmatmul.mubr.msk.f32.gmra.mrb[4].mxu1 %vm1079_vm1, %v1266_v24  ;;  %v1270_v32 = vsel %vm1262_vm10, 0.0, %v1150_v31  ;;  %v1157_v42 = vld [vmem:[#allocation4 + $0x32] sm:$0xff]  ;;  %v1158_v45 = vld [vmem:[#allocation4 + $0x3a] sm:$0xff] }
 0x191   :  { %3884 = vmatprep.mubr.msk.f32.mxu1 %vm1079_vm1, %v1267_v25  ;;  %v1285_v44 = vsel %vm1277_vm2, 0.0, %v1157_v42  ;;  %v1286_v49 = vsel %vm1278_vm3, 0.0, %v1158_v45 }
 0x194   :  { %3885 = vmatmul.mubr.msk.f32.gmra.mrb[6].mxu1 %vm1079_vm1, %v1268_v2  ;;  %v1843_v2 = vld [vmem:[#allocation12 + $0x18] sm:$0xff] }
 0x195   :  { %3887 = vmatprep.mubr.msk.f32.mxu1 %vm1079_vm1, %v1269_v28  ;;  %v4941_v29 = vpack.c.bf16 %v1843_v2, %v1842_v30  ;;  %v2048_v30 = vld [vmem:[%s5331_s6 + $0x58] sm:$0xff] }
 0x198   :  { %3888 = vmatmul.mubr.msk.f32.gmra.mrb[8].mxu1 %vm1079_vm1, %v1270_v32 }
 0x199   :  { %3894 = vmatprep.mubr.msk.f32.mxu1 %vm1079_vm1, %v1279_v33 }
 0x19c   :  { %3895 = vmatmul.mubr.msk.f32.vlgmr.msra.gmra.mrb[2].mxu1 %vm1079_vm1, %v1280_v35  ;;  %v92_v35 = vld [vmem:[%s5334_s9 + $0x2] ss:$0 sm:$0xff] }
 0x19d   :  { %3897 = vmatprep.mubr.msk.f32.mxu1 %vm1079_vm1, %v1281_v36  ;;  %4074 = vmatpush3.bf16.msra.mxu1 %v4071_v52 }
 0x19e   :  { %4076 = vmatprep.subr.bf16.mxu1 %v4075_v55 }
 0x1a0   :  { %3898 = vmatmul.mubr.msk.f32.gmra.mrb[4].mxu1 %vm1079_vm1, %v1282_v39 }
 0x1a1   :  { %3900 = vmatprep.mubr.msk.f32.mxu1 %vm1079_vm1, %v1283_v40  ;;  %4078 = vmatpush3.bf16.msra.mxu1 %v4075_v55 }
 0x1a2   :  { %4079 = vmatprep.subr.bf16.mxu1 %v4534_v57 }
 0x1a4   :  { %3901 = vmatmul.mubr.msk.f32.gmra.mrb[6].mxu1 %vm1079_vm1, %v1284_v43 }
 0x1a5   :  { %3903 = vmatprep.mubr.msk.f32.mxu1 %vm1079_vm1, %v1285_v44 }
 0x1a8   :  { %3904 = vmatmul.mubr.msk.f32.gmra.mrb[8].mxu1 %vm1079_vm1, %v1286_v49  ;;  %vm1706_vm1 = vcmask 261120  }
 0x26f   :  { %v3896_v60 = vpop.f32.mrb[2].mxu1 }
 0x270   :  { %v1691_v62 = vadd.f32 %v3896_v60, %v91_v59  ;;  %v1643_v63 = vpop.f32.mrb[3].mxu1 }
 0x271   :  { %v1690_v0 = vadd.f32 %v1643_v63, %v91_v59 }
 0x272   :  { %v1699_v1 = vmax.f32 %v1691_v62, 0.0 }
 0x273   :  { %v1698_v3 = vmax.f32 %v1690_v0, 0.0  ;;  %v3899_v46 = vpop.f32.mrb[4].mxu1 }
 0x274   :  { %1708 = vst.msk [vmem:[#allocation5 + $0x8] sm:$0xff] %vm1706_vm1, %v1699_v1  ;;  %v1693_v4 = vadd.f32 %v3899_v46, %v91_v59  ;;  %v1653_v47 = vpop.f32.mrb[5].mxu1  ;;  %v1943_v1 = vld [vmem:[%s5330_s5 + $0x8] sm:$0xff]  ;;  %v1942_v46 = vld [vmem:[%s5330_s5] sm:$0xff] }
 0x275   :  { %1707 = vst.msk [vmem:[#allocation5] sm:$0xff] %vm1706_vm1, %v1698_v3  ;;  %v1692_v5 = vadd.f32 %v1653_v47, %v91_v59  ;;  %v1945_v3 = vld [vmem:[%s5330_s5 + $0x18] sm:$0xff]  ;;  %v1944_v47 = vld [vmem:[%s5330_s5 + $0x10] sm:$0xff] }
 0x276   :  { %v1701_v48 = vmax.f32 %v1693_v4, 0.0  ;;  %v4968_v4 = vpack.c.bf16 %v1945_v3, %v1943_v1 }
 0x277   :  { %v1700_v6 = vmax.f32 %v1692_v5, 0.0  ;;  %v3902_v8 = vpop.f32.mrb[6].mxu1  ;;  %v1947_v5 = vld [vmem:[%s5330_s5 + $0x28] sm:$0xff] }
 0x278   :  { %1710 = vst.msk [vmem:[#allocation5 + $0x18] sm:$0xff] %vm1706_vm1, %v1701_v48  ;;  %v1695_v9 = vadd.f32 %v3902_v8, %v91_v59  ;;  %v1663_v10 = vpop.f32.mrb[7].mxu1  ;;  %v1949_v48 = vld [vmem:[%s5330_s5 + $0x38] sm:$0xff]  ;;  %4116 = vmatprep.subr.bf16.mxu0 %v4968_v4 }
 0x279   :  { %1709 = vst.msk [vmem:[#allocation5 + $0x10] sm:$0xff] %vm1706_vm1, %v1700_v6  ;;  %v1694_v11 = vadd.f32 %v1663_v10, %v91_v59  ;;  %v4979_v6 = vpack.c.bf16 %v1944_v47, %v1942_v46  ;;  %v4981_v8 = vpack.c.bf16 %v1949_v48, %v1947_v5  ;;  %v1948_v10 = vld [vmem:[%s5330_s5 + $0x30] sm:$0xff] }
 0x27a   :  { %v1703_v12 = vmax.f32 %v1695_v9, 0.0  ;;  %v1946_v9 = vld [vmem:[%s5330_s5 + $0x20] sm:$0xff] }
 0x27b   :  { %v1702_v13 = vmax.f32 %v1694_v11, 0.0  ;;  %v3905_v14 = vpop.f32.mrb[8].mxu1  ;;  %v2038_v11 = vld [vmem:[%s5331_s6 + $0x8] sm:$0xff]  ;;  %4118 = vmatpush1.bf16.msra.mxu0 %v4979_v6 }
 0x27c   :  { %1712 = vst.msk [vmem:[#allocation5 + $0x28] sm:$0xff] %vm1706_vm1, %v1703_v12  ;;  %v1697_v15 = vadd.f32 %v3905_v14, %v91_v59  ;;  %v1673_v16 = vpop.f32.mrb[9].mxu1  ;;  %v1715_v17 = vld [vmem:[#allocation5] ss:$2 sm:$0xff]  ;;  %v1723_v56 = vld [vmem:[#allocation5 + $0x1] ss:$2 sm:$0xff]  ;;  %4120 = vmatprep.subr.bf16.mxu0 %v4981_v8 }
 0x27d   :  { %1711 = vst.msk [vmem:[#allocation5 + $0x20] sm:$0xff] %vm1706_vm1, %v1702_v13  ;;  %v1696_v18 = vadd.f32 %v1673_v16, %v91_v59  ;;  %v1730_v22 = vmax.f32 %v1715_v17, %v1723_v56  ;;  %v2040_v12 = vld [vmem:[%s5331_s6 + $0x18] sm:$0xff]  ;;  %v4998_v13 = vpack.c.bf16 %v1948_v10, %v1946_v9  ;;  %v2037_v56 = vld [vmem:[%s5331_s6] sm:$0xff] }
 0x27e   :  { %v1705_v23 = vmax.f32 %v1697_v15, 0.0  ;;  %v5002_v14 = vpack.c.bf16 %v2040_v12, %v2038_v11 }
 0x27f   :  { %v1704_v61 = vmax.f32 %v1696_v18, 0.0  ;;  %3914 = vmatprep.mubr.msk.f32.mxu1 %vm1706_vm1, %v1730_v22  ;;  %4122 = vmatpush1.bf16.msra.mxu0 %v4998_v13  ;;  %v2039_v18 = vld [vmem:[%s5331_s6 + $0x10] sm:$0xff]  ;;  %v2042_v22 = vld [vmem:[%s5331_s6 + $0x28] sm:$0xff] }
 0x280   :  { %1714 = vst.msk [vmem:[#allocation5 + $0x38] sm:$0xff] %vm1706_vm1, %v1705_v23  ;;  %v1717_v24 = vld [vmem:[#allocation5 + $0x10] ss:$2 sm:$0xff]  ;;  %v1725_v25 = vld [vmem:[#allocation5 + $0x11] ss:$2 sm:$0xff]  ;;  %4124 = vmatprep.subr.bf16.mxu0 %v5002_v14  ;;  %v5023_v21 = vpack.c.bf16 %v2039_v18, %v2037_v56  ;;  %v5025_v23 = vpack.c.bf16 %v2044_v19, %v2042_v22 }
 0x281   :  { %1713 = vst.msk [vmem:[#allocation5 + $0x30] sm:$0xff] %vm1706_vm1, %v1704_v61  ;;  %v1731_v27 = vmax.f32 %v1717_v24, %v1725_v25  ;;  %v2041_v61 = vld [vmem:[%s5331_s6 + $0x20] sm:$0xff]  ;;  %v2043_v24 = vld [vmem:[%s5331_s6 + $0x30] sm:$0xff] }
 0x282   :  { %v5041_v2 = vpack.c.bf16 %v2043_v24, %v2041_v61 }
 0x283   :  { %3915 = vmatmul.mubr.msk.f32.vlgmr.msra.gmra.mrb[10].mxu1 %vm1706_vm1, %v1731_v27  ;;  %v2046_v27 = vld [vmem:[%s5331_s6 + $0x48] sm:$0xff] }
 0x284   :  { %v1719_v28 = vld [vmem:[#allocation5 + $0x20] ss:$2 sm:$0xff]  ;;  %v1727_v31 = vld [vmem:[#allocation5 + $0x21] ss:$2 sm:$0xff]  ;;  %4081 = vmatpush3.bf16.msra.mxu1 %v4936_v26 }
 0x285   :  { %v1732_v32 = vmax.f32 %v1719_v28, %v1727_v31  ;;  %4082 = vmatprep.subr.bf16.mxu1 %v4534_v57  ;;  %v5045_v28 = vpack.c.bf16 %v2048_v30, %v2046_v27  ;;  %v2045_v31 = vld [vmem:[%s5331_s6 + $0x40] sm:$0xff] }
 0x287   :  { %3917 = vmatprep.mubr.msk.f32.mxu1 %vm1706_vm1, %v1732_v32  ;;  %v2047_v32 = vld [vmem:[%s5331_s6 + $0x50] sm:$0xff] }
 0x288   :  { %v1721_v33 = vld [vmem:[#allocation5 + $0x30] ss:$2 sm:$0xff]  ;;  %v1729_v34 = vld [vmem:[#allocation5 + $0x31] ss:$2 sm:$0xff]  ;;  %4084 = vmatpush3.bf16.msra.mxu1 %v4941_v29 }
 0x289   :  { %v1733_v7 = vmax.f32 %v1721_v33, %v1729_v34  ;;  %4086 = vmatprep.subr.bf16.mxu1 %v4968_v4  ;;  %v2050_v33 = vld [vmem:[%s5331_s6 + $0x68] sm:$0xff]  ;;  %v2052_v34 = vld [vmem:[%s5331_s6 + $0x78] sm:$0xff] }
 0x28b   :  { %3918 = vmatmul.mubr.msk.f32.gmra.mrb[12].mxu1 %vm1706_vm1, %v1733_v7  ;;  %v5060_v7 = vpack.c.bf16 %v2047_v32, %v2045_v31 }
 0x28c   :  { %3928 = vmatprep.mubr.msk.f32.mxu1 %vm4536_vm4, %v4535_v58 }
 0x28f   :  { %3929 = vmatmul.mubr.f32.vlgmr.msra.gmra.mrb[14].mxu1 %v4535_v58 }
 0x290   :  { %2030 = vmatprep.mubr.f32.mxu1 %v4535_v58  ;;  %4088 = vmatpush1.bf16.msra.mxu1 %v4979_v6 }
 0x291   :  { %4090 = vmatprep.subr.bf16.mxu1 %v4981_v8 }
 0x294   :  { %4092 = vmatpush1.bf16.msra.mxu1 %v4998_v13 }
 0x295   :  { %4094 = vmatprep.subr.bf16.mxu1 %v5002_v14 }
 0x356   :  { %v3916_v36 = vpop.f32.mrb[10].mxu1 }
 0x357   :  { %v1822_v37 = vadd.f32 %v3916_v36, %v92_v35  ;;  %v1816_v38 = vpop.f32.mrb[11].mxu1  ;;  %v2049_v36 = vld [vmem:[%s5331_s6 + $0x60] sm:$0xff] }
 0x358   :  { %v1817_v39 = vadd.f32 %v1816_v38, %v92_v35 }
 0x359   :  { %1836 = vst [vmem:[#allocation6 + $0x8] sm:$0xff] %v1822_v37  ;;  %v2051_v37 = vld [vmem:[%s5331_s6 + $0x70] sm:$0xff] }
 0x35a   :  { %1835 = vst [vmem:[#allocation6] sm:$0xff] %v1817_v39  ;;  %v5072_v38 = vpack.c.bf16 %v2051_v37, %v2049_v36  ;;  %v1953_v39 = vsub.s32 0, %v4757_v20 }
 0x35e   :  { %v3919_v40 = vpop.f32.mrb[12].mxu1 }
 0x35f   :  { %v1832_v41 = vadd.f32 %v3919_v40, %v92_v35  ;;  %v1826_v42 = vpop.f32.mrb[13].mxu1  ;;  %v3517_v40 = vld [vmem:[%s5334_s9 + $0x3] ss:$8 sm:$0x3] }
 0x360   :  { %v1827_v43 = vadd.f32 %v1826_v42, %v92_v35  ;;  %v5063_v35 = vpack.c.bf16 %v2052_v34, %v2050_v33 }
 0x361   :  { %1838 = vst [vmem:[#allocation6 + $0x18] sm:$0xff] %v1832_v41  ;;  %v5095_v41 = vrot.slane %v3517_v40, %v1953_v39 }
 0x362   :  { %1837 = vst [vmem:[#allocation6 + $0x10] sm:$0xff] %v1827_v43  ;;  %v1913_v44 = vpop.f32.mrb[14].mxu1 }
 0x363   :  { %v3930_v45 = vpop.f32.mrb[15].mxu1 }
 0x369   :  { %v1839_v49 = vld [vmem:[#allocation6] ss:$4 sm:$0xff]  ;;  %v2460_v32 = vld [vmem:[#allocation6 + $0x2] ss:$4 sm:$0xff] }
 0x36a   :  { %v1917_v50 = vadd.f32 %v1913_v44, %v1839_v49  ;;  %v1957_v49 = vsub.s32 1, %v4757_v20 }
 0x36c   :  { %4336 = vtanh.f32 %v1917_v50  ;;  %v3599_v52 = vmul.f32 -1.442695, %v1917_v50  ;;  %v2157_v50 = vld [vmem:[#allocation6 + $0x1] ss:$4 sm:$0xff] }
 0x36e   :  { %4338 = vpow2.f32 %v3599_v52  ;;  %v5099_v52 = vrot.slane %v3517_v40, %v1957_v49 }
 0x376   :  { %v4337_v51 = vpop.eup %4336 }
 0x377   :  { %1927 = vrot.lane.b32.xlu0 %v4337_v51, %s4537_s3 }
 0x378   :  { %v4339_v53 = vpop.eup %4338 }
 0x379   :  { %v1921_v54 = vadd.f32 1.0, %v4339_v53 }
 0x37b   :  { %4340 = vrcp.f32 %v1921_v54 }
 0x385   :  { %v4341_v55 = vpop.eup %4340 }
 0x386   :  { %v1925_v62 = vmul.f32 0.0, %v4341_v55 }
 0x3e9   :  { %v1928_v59 = vpop.permute.xlu0 %1927 }
 0x3ea   :  { %v1930_v60 = vmul.f32 %v4341_v55, %v1928_v59 }
 0x3ec   :  { %1932 = vrot.lane.b32.xlu0 %v1930_v60, %s4538_s14 }
 0x45e   :  { %v1933_v63 = vpop.permute.xlu0 %1932 }
 0x45f   :  { %v4956_v0 = vadd.f32 %v1933_v63, %v1925_v62 }
 0x461   :  { %4342 = vtanh.f32 %v4956_v0 }
 0x46b   :  { %v4343_v15 = vpop.eup %4342 }
 0x46c   :  { %1938 = vrot.lane.b32.xlu1 %v4343_v15, %s4537_s3 }
 0x4de   :  { %v1939_v16 = vpop.permute.xlu1 %1938 }
 0x4df   :  { %v1941_v17 = vmul.f32 %v4341_v55, %v1939_v16 }
 0x4e1   :  { %1962 = vrot.lane.b32.xlu1 %v1941_v17, %s4538_s14 }
 0x553   :  { %v1963_v25 = vpop.permute.xlu1 %1962 }
 0x554   :  { %3600 = vmatmul.mubr.msk.f32.vlgmr.msra.gmra.mrb[16].mxu1 %vm1706_vm1, %v1963_v25 }
 0x555   :  { %4096 = vmatpush1.bf16.msra.mxu1 %v5023_v21  ;;  %2120 = vmatprep.mubr.f32.mxu1 %v4535_v58 }
 0x556   :  { %4098 = vmatprep.subr.bf16.mxu1 %v5025_v23 }
 0x559   :  { %4100 = vmatpush1.bf16.msra.mxu1 %v5041_v2 }
 0x55a   :  { %4102 = vmatprep.subr.bf16.mxu1 %v5045_v28 }
 0x55d   :  { %4104 = vmatpush1.bf16.msra.mxu1 %v5060_v7 }
 0x55e   :  { %4106 = vmatprep.subr.bf16.mxu1 %v5063_v35 }
 0x561   :  { %4108 = vmatpush1.bf16.msra.mxu1 %v5072_v38 }
 0x562   :  { %4109 = vmatprep.subr.bf16.mxu1 %v4534_v57 }
 0x564   :  { %2121 = vmatmul.mubr.f32.vlgmr.msra.gmra.mrb[16].mxu1 %v4535_v58 }
 0x565   :  { %4111 = vmatpush3.bf16.msra.mxu1 %v4936_v26  ;;  %3939 = vmatprep.mubr.msk.f32.mxu1 %vm4536_vm4, %v4535_v58 }
 0x566   :  { %4112 = vmatprep.subr.bf16.mxu1 %v4534_v57 }
 0x569   :  { %4114 = vmatpush3.bf16.msra.mxu1 %v4941_v29 }
 0x56a   :  { %4139 = vmatprep.subr.bf16.mxu1 %v4534_v57 }
 0x56c   :  { %3940 = vmatmul.mubr.msk.f32.vlgmr.msra.gmra.mrb[18].mxu1 %vm1706_vm1, %v1963_v25 }
 0x56d   :  { %4141 = vmatpush3.bf16.msra.mxu1 %v4936_v26  ;;  %3950 = vmatprep.mubr.msk.f32.mxu1 %vm4536_vm4, %v4535_v58 }
 0x56e   :  { %4142 = vmatprep.subr.bf16.mxu1 %v4534_v57 }
 0x571   :  { %4144 = vmatpush3.bf16.msra.mxu1 %v4941_v29 }
 0x572   :  { %4146 = vmatprep.subr.bf16.mxu1 %v4968_v4 }
 0x637   :  { %v2122_v42 = vpop.f32.mrb[16].mxu1 }
 0x638   :  { %v4263_v43 = vadd.f32 %v2122_v42, %v5095_v41  ;;  %v2124_v44 = vpop.f32.mrb[17].mxu1 }
 0x639   :  { %v4264_v55 = vadd.f32 %v2124_v44, %v5099_v52 }
 0x63a   :  { %v3601_v45 = vmul.f32 -1.442695, %v4263_v43 }
 0x63b   :  { %v3602_v16 = vmul.f32 -1.442695, %v4264_v55 }
 0x63c   :  { %4344 = vpow2.f32 %v3601_v45 }
 0x63f   :  { %v2228_v51 = vpop.f32.mrb[18].mxu1 }
 0x640   :  { %v2232_v53 = vadd.f32 %v2228_v51, %v2157_v50  ;;  %v3941_v54 = vpop.f32.mrb[19].mxu1 }
 0x642   :  { %4346 = vtanh.f32 %v2232_v53  ;;  %v3604_v20 = vmul.f32 -1.442695, %v2232_v53 }
 0x643   :  { %4348 = vtanh.f32 %v4264_v55 }
 0x646   :  { %v4345_v59 = vpop.eup %4344 }
 0x647   :  { %v2132_v60 = vadd.f32 1.0, %v4345_v59 }
 0x649   :  { %4350 = vrcp.f32 %v2132_v60 }
 0x64a   :  { %4352 = vpow2.f32 %v3604_v20 }
 0x64c   :  { %v4347_v62 = vpop.eup %4346 }
 0x64d   :  { %2242 = vrot.lane.b32.xlu0 %v4347_v62, %s4537_s3  ;;  %v4349_v63 = vpop.eup %4348 }
 0x653   :  { %v4351_v1 = vpop.eup %4350 }
 0x654   :  { %v2143_v3 = vmul.f32 %v4351_v1, %v4349_v63  ;;  %v4353_v46 = vpop.eup %4352  ;;  %v2142_v19 = vmul.f32 0.0, %v4351_v1 }
 0x655   :  { %v2236_v47 = vadd.f32 1.0, %v4353_v46 }
 0x657   :  { %4354 = vrcp.f32 %v2236_v47 }
 0x661   :  { %v4355_v5 = vpop.eup %4354 }
 0x662   :  { %v2240_v10 = vmul.f32 %v4355_v5, %v4956_v0 }
 0x6bf   :  { %v2243_v48 = vpop.permute.xlu0 %2242 }
 0x6c0   :  { %v2245_v9 = vmul.f32 %v4355_v5, %v2243_v48 }
 0x6c2   :  { %2247 = vrot.lane.b32.xlu1 %v2245_v9, %s4538_s14 }
 0x734   :  { %v2248_v11 = vpop.permute.xlu1 %2247 }
 0x735   :  { %v5105_v12 = vadd.f32 %v2248_v11, %v2240_v10 }
 0x737   :  { %4356 = vtanh.f32 %v5105_v12 }
 0x738   :  { %4358 = vpow2.f32 %v3602_v16 }
 0x741   :  { %v4357_v15 = vpop.eup %4356 }
 0x742   :  { %2253 = vrot.lane.b32.xlu0 %v4357_v15, %s4537_s3  ;;  %v4359_v17 = vpop.eup %4358 }
 0x743   :  { %v2139_v22 = vadd.f32 1.0, %v4359_v17 }
 0x745   :  { %4360 = vrcp.f32 %v2139_v22 }
 0x746   :  { %2145 = vrot.lane.b32.xlu0 %v2143_v3, %s4537_s3 }
 0x74f   :  { %v4361_v24 = vpop.eup %4360 }
 0x7b4   :  { %v2254_v56 = vpop.permute.xlu0 %2253 }
 0x7b5   :  { %v2256_v18 = vmul.f32 %v4355_v5, %v2254_v56 }
 0x7b7   :  { %2266 = vrot.lane.b32.xlu1 %v2256_v18, %s4538_s14 }
 0x7b8   :  { %v2146_v0 = vpop.permute.xlu0 %2145 }
 0x7b9   :  { %v5111_v61 = vadd.f32 %v2146_v0, %v2142_v19 }
 0x7bb   :  { %4362 = vtanh.f32 %v5111_v61 }
 0x7c5   :  { %v4363_v25 = vpop.eup %4362 }
 0x7c6   :  { %v2150_v27 = vmul.f32 %v4363_v25, %v4361_v24 }
 0x7c8   :  { %2152 = vrot.lane.b32.xlu1 %v2150_v27, %s4537_s3 }
 0x829   :  { %v2267_v30 = vpop.permute.xlu1 %2266 }
 0x82a   :  { %3605 = vmatmul.mubr.msk.f32.vlgmr.msra.gmra.mrb[16].mxu0 %vm1706_vm1, %v2267_v30  ;;  %3951 = vmatmul.mubr.msk.f32.vlgmr.msra.gmra.mrb[20].mxu1 %vm1706_vm1, %v2267_v30 }
 0x82b   :  { %4126 = vmatpush1.bf16.msra.mxu0 %v5023_v21  ;;  %2423 = vmatprep.mubr.f32.mxu0 %v4535_v58 }
 0x82c   :  { %4128 = vmatprep.subr.bf16.mxu0 %v5025_v23  ;;  %4148 = vmatpush1.bf16.msra.mxu1 %v4979_v6 }
 0x82d   :  { %4150 = vmatprep.subr.bf16.mxu1 %v4981_v8  ;;  %2637 = vmatprep.mubr.f32.mxu1 %v4535_v58 }
 0x82f   :  { %4130 = vmatpush1.bf16.msra.mxu0 %v5041_v2 }
 0x830   :  { %4132 = vmatprep.subr.bf16.mxu0 %v5045_v28  ;;  %4152 = vmatpush1.bf16.msra.mxu1 %v4998_v13 }
 0x831   :  { %4154 = vmatprep.subr.bf16.mxu1 %v5002_v14 }
 0x833   :  { %4134 = vmatpush1.bf16.msra.mxu0 %v5060_v7 }
 0x834   :  { %4136 = vmatprep.subr.bf16.mxu0 %v5063_v35 }
 0x837   :  { %4138 = vmatpush1.bf16.msra.mxu0 %v5072_v38 }
 0x838   :  { %4169 = vmatprep.subr.bf16.mxu0 %v4534_v57 }
 0x83a   :  { %v2153_v31 = vpop.permute.xlu1 %2152 }
 0x83b   :  { %2155 = vst.msk [vmem:[#allocation7] sm:$0xff] %vm2053_vm5, %v2153_v31  ;;  %3606 = vmatmul.mubr.msk.f32.vlgmr.msra.gmra.mrb[16].mxu0 %vm2053_vm5, %v2153_v31 }
 0x83c   :  { %4171 = vmatpush3.bf16.msra.mxu0 %v4936_v26  ;;  %3961 = vmatprep.mubr.msk.f32.mxu0 %vm4536_vm4, %v4535_v58 }
 0x83d   :  { %4172 = vmatprep.subr.bf16.mxu0 %v4534_v57 }
 0x840   :  { %4174 = vmatpush3.bf16.msra.mxu0 %v4941_v29 }
 0x841   :  { %4176 = vmatprep.subr.bf16.mxu0 %v4968_v4 }
 0x8fd   :  { %v2531_v33 = vpop.f32.mrb[20].mxu1 }
 0x8fe   :  { %v2535_v34 = vadd.f32 %v2531_v33, %v2460_v32  ;;  %v3952_v36 = vpop.f32.mrb[21].mxu1 }
 0x900   :  { %4364 = vtanh.f32 %v2535_v34  ;;  %v3610_v50 = vmul.f32 -1.442695, %v2535_v34 }
 0x90a   :  { %v4365_v37 = vpop.eup %4364 }
 0x90b   :  { %2545 = vrot.lane.b32.xlu0 %v4365_v37, %s4537_s3 }
 0x90e   :  { %v2425_v39 = vpop.f32.mrb[16].mxu0 }
 0x90f   :  { %v4265_v26 = vadd.f32 %v2425_v39, %v5095_v41  ;;  %v2427_v40 = vpop.f32.mrb[17].mxu0 }
 0x910   :  { %v4266_v43 = vadd.f32 %v2427_v40, %v5099_v52 }
 0x911   :  { %v3607_v42 = vmul.f32 -1.442695, %v4265_v26 }
 0x912   :  { %v3608_v3 = vmul.f32 -1.442695, %v4266_v43 }
 0x913   :  { %4366 = vpow2.f32 %v3607_v42 }
 0x914   :  { %4368 = vtanh.f32 %v4266_v43 }
 0x91d   :  { %v4367_v44 = vpop.eup %4366 }
 0x91e   :  { %v2435_v29 = vadd.f32 1.0, %v4367_v44  ;;  %v4369_v4 = vpop.eup %4368 }
 0x920   :  { %4370 = vrcp.f32 %v2435_v29 }
 0x921   :  { %4372 = vpow2.f32 %v3610_v50 }
 0x92a   :  { %v4371_v45 = vpop.eup %4370 }
 0x92b   :  { %v2446_v49 = vmul.f32 %v4371_v45, %v4369_v4  ;;  %v4373_v51 = vpop.eup %4372  ;;  %v2445_v48 = vmul.f32 %v4371_v45, %v5111_v61 }
 0x92c   :  { %v2539_v53 = vadd.f32 1.0, %v4373_v51 }
 0x92e   :  { %4374 = vrcp.f32 %v2539_v53 }
 0x938   :  { %v4375_v54 = vpop.eup %4374 }
 0x939   :  { %v2543_v60 = vmul.f32 %v4375_v54, %v5105_v12 }
 0x97d   :  { %v2546_v55 = vpop.permute.xlu0 %2545 }
 0x97e   :  { %v2548_v59 = vmul.f32 %v4375_v54, %v2546_v55 }
 0x980   :  { %2550 = vrot.lane.b32.xlu1 %v2548_v59, %s4538_s14 }
 0x9f2   :  { %v2551_v62 = vpop.permute.xlu1 %2550 }
 0x9f3   :  { %v5144_v63 = vadd.f32 %v2551_v62, %v2543_v60 }
 0x9f5   :  { %4376 = vtanh.f32 %v5144_v63 }
 0x9f6   :  { %4378 = vpow2.f32 %v3608_v3 }
 0x9ff   :  { %v4377_v1 = vpop.eup %4376 }
 0xa00   :  { %2556 = vrot.lane.b32.xlu0 %v4377_v1, %s4537_s3  ;;  %v4379_v20 = vpop.eup %4378  ;;  %v3150_v1 = vld [vmem:[#allocation13 + $0x8] sm:$0xff] }
 0xa01   :  { %v2442_v5 = vadd.f32 1.0, %v4379_v20  ;;  %v3152_v20 = vld [vmem:[#allocation13 + $0x18] sm:$0xff] }
 0xa03   :  { %4380 = vrcp.f32 %v2442_v5 }
 0xa04   :  { %2448 = vrot.lane.b32.xlu0 %v2446_v49, %s4537_s3 }
 0xa0d   :  { %v4381_v11 = vpop.eup %4380 }
 0xa72   :  { %v2557_v46 = vpop.permute.xlu0 %2556 }
 0xa73   :  { %v2559_v47 = vmul.f32 %v4375_v54, %v2557_v46 }
 0xa75   :  { %2569 = vrot.lane.b32.xlu1 %v2559_v47, %s4538_s14 }
 0xa76   :  { %v2449_v9 = vpop.permute.xlu0 %2448 }
 0xa77   :  { %v5151_v10 = vadd.f32 %v2449_v9, %v2445_v48 }
 0xa79   :  { %4382 = vtanh.f32 %v5151_v10 }
 0xa83   :  { %v4383_v12 = vpop.eup %4382 }
 0xa84   :  { %v2453_v15 = vmul.f32 %v4383_v12, %v4381_v11 }
 0xa86   :  { %2455 = vrot.lane.b32.xlu1 %v2453_v15, %s4537_s3 }
 0xae7   :  { %v2570_v16 = vpop.permute.xlu1 %2569 }
 0xae8   :  { %3611 = vmatmul.mubr.msk.f32.vlgmr.msra.gmra.mrb[22].mxu1 %vm1706_vm1, %v2570_v16  ;;  %3962 = vmatmul.mubr.msk.f32.vlgmr.msra.gmra.mrb[18].mxu0 %vm1706_vm1, %v2570_v16 }
 0xae9   :  { %4156 = vmatpush1.bf16.msra.mxu1 %v5023_v21  ;;  %2726 = vmatprep.mubr.f32.mxu1 %v4535_v58 }
 0xaea   :  { %4158 = vmatprep.subr.bf16.mxu1 %v5025_v23  ;;  %4178 = vmatpush1.bf16.msra.mxu0 %v4979_v6 }
 0xaeb   :  { %4180 = vmatprep.subr.bf16.mxu0 %v4981_v8  ;;  %2940 = vmatprep.mubr.f32.mxu0 %v4535_v58  ;;  %v2763_v8 = vld [vmem:[#allocation6 + $0x3] ss:$4 sm:$0xff] }
 0xaed   :  { %4160 = vmatpush1.bf16.msra.mxu1 %v5041_v2 }
 0xaee   :  { %4162 = vmatprep.subr.bf16.mxu1 %v5045_v28  ;;  %4182 = vmatpush1.bf16.msra.mxu0 %v4998_v13 }
 0xaef   :  { %4184 = vmatprep.subr.bf16.mxu0 %v5002_v14 }
 0xaf1   :  { %4164 = vmatpush1.bf16.msra.mxu1 %v5060_v7 }
 0xaf2   :  { %4166 = vmatprep.subr.bf16.mxu1 %v5063_v35 }
 0xaf5   :  { %4168 = vmatpush1.bf16.msra.mxu1 %v5072_v38 }
 0xaf6   :  { %4199 = vmatprep.subr.bf16.mxu1 %v4534_v57 }
 0xaf8   :  { %v2456_v6 = vpop.permute.xlu1 %2455 }
 0xaf9   :  { %2458 = vst.msk [vmem:[#allocation7 + $0x8] sm:$0xff] %vm2053_vm5, %v2456_v6  ;;  %3612 = vmatmul.mubr.msk.f32.vlgmr.msra.gmra.mrb[22].mxu1 %vm2053_vm5, %v2456_v6 }
 0xafa   :  { %3980 = vmatprep.mubr.msk.f32.mxu1 %vm4536_vm4, %v4535_v58 }
 0xb00   :  { %v5218_v47 = vld [vmem:[#allocation7 + $0x8] sm:$0xff] }
 0xbbb   :  { %v2834_v13 = vpop.f32.mrb[18].mxu0 }
 0xbbc   :  { %v2838_v17 = vadd.f32 %v2834_v13, %v2763_v8  ;;  %v3963_v14 = vpop.f32.mrb[19].mxu0 }
 0xbbd   :  { %v3067_v14 = vld [vmem:[%s5332_s7 + $0x10] sm:$0xff] }
 0xbbe   :  { %4384 = vtanh.f32 %v2838_v17  ;;  %v3616_v32 = vmul.f32 -1.442695, %v2838_v17 }
 0xbc8   :  { %v4385_v56 = vpop.eup %4384 }
 0xbc9   :  { %2848 = vrot.lane.b32.xlu0 %v4385_v56, %s4537_s3 }
 0xbcc   :  { %v2728_v18 = vpop.f32.mrb[22].mxu1 }
 0xbcd   :  { %v4267_v22 = vadd.f32 %v2728_v18, %v5095_v41  ;;  %v2730_v19 = vpop.f32.mrb[23].mxu1  ;;  %v3068_v18 = vld [vmem:[%s5332_s7 + $0x18] sm:$0xff] }
 0xbce   :  { %v4268_v61 = vadd.f32 %v2730_v19, %v5099_v52  ;;  %v3069_v19 = vld [vmem:[%s5332_s7 + $0x20] sm:$0xff] }
 0xbcf   :  { %v3613_v0 = vmul.f32 -1.442695, %v4267_v22  ;;  %v4203_v22 = vpack.c.bf16 %v3068_v18, %v3067_v14 }
 0xbd0   :  { %v3614_v26 = vmul.f32 -1.442695, %v4268_v61 }
 0xbd1   :  { %4386 = vpow2.f32 %v3613_v0  ;;  %v3070_v0 = vld [vmem:[%s5332_s7 + $0x28] sm:$0xff] }
 0xbd2   :  { %4388 = vtanh.f32 %v4268_v61  ;;  %v4206_v61 = vpack.c.bf16 %v3070_v0, %v3069_v19 }
 0xbdb   :  { %v4387_v24 = vpop.eup %4386 }
 0xbdc   :  { %v2738_v25 = vadd.f32 1.0, %v4387_v24  ;;  %v4389_v27 = vpop.eup %4388  ;;  %v3071_v24 = vld [vmem:[%s5332_s7 + $0x30] sm:$0xff] }
 0xbde   :  { %4390 = vrcp.f32 %v2738_v25  ;;  %v3072_v25 = vld [vmem:[%s5332_s7 + $0x38] sm:$0xff] }
 0xbdf   :  { %4392 = vpow2.f32 %v3616_v32 }
 0xbe8   :  { %v4391_v30 = vpop.eup %4390 }
 0xbe9   :  { %v2749_v31 = vmul.f32 %v4391_v30, %v4389_v27  ;;  %v4393_v33 = vpop.eup %4392  ;;  %v2748_v4 = vmul.f32 %v4391_v30, %v5151_v10  ;;  %v4209_v27 = vpack.c.bf16 %v3072_v25, %v3071_v24 }
 0xbea   :  { %v2842_v34 = vadd.f32 1.0, %v4393_v33 }
 0xbec   :  { %4394 = vrcp.f32 %v2842_v34 }
 0xbed   :  { %4396 = vpow2.f32 %v3614_v26 }
 0xbf6   :  { %v4395_v36 = vpop.eup %4394 }
 0xbf7   :  { %v4397_v40 = vpop.eup %4396  ;;  %v2846_v42 = vmul.f32 %v4395_v36, %v5144_v63  ;;  %v3149_v63 = vld [vmem:[#allocation13] sm:$0xff] }
 0xbf8   :  { %v2745_v29 = vadd.f32 1.0, %v4397_v40  ;;  %v5198_v3 = vpack.c.bf16 %v3150_v1, %v3149_v63 }
 0xc3b   :  { %v2849_v37 = vpop.permute.xlu0 %2848 }
 0xc3c   :  { %v2851_v39 = vmul.f32 %v4395_v36, %v2849_v37 }
 0xc3e   :  { %2853 = vrot.lane.b32.xlu1 %v2851_v39, %s4538_s14 }
 0xc42   :  { %2751 = vrot.lane.b32.xlu1 %v2749_v31, %s4537_s3 }
 0xcb0   :  { %v2854_v43 = vpop.permute.xlu1 %2853 }
 0xcb1   :  { %v2856_v44 = vadd.f32 %v2854_v43, %v2846_v42  ;;  %v5279_v43 = vld [vmem:[#allocation7] sm:$0xff] }
 0xcb3   :  { %4398 = vtanh.f32 %v2856_v44 }
 0xcb4   :  { %v2752_v45 = vpop.permute.xlu1 %2751  ;;  %4400 = vrcp.f32 %v2745_v29 }
 0xcb5   :  { %v5182_v49 = vadd.f32 %v2752_v45, %v2748_v4 }
 0xcb7   :  { %4402 = vtanh.f32 %v5182_v49 }
 0xcbd   :  { %v4399_v50 = vpop.eup %4398 }
 0xcbe   :  { %2859 = vrot.lane.b32.xlu0 %v4399_v50, %s4537_s3  ;;  %v4401_v51 = vpop.eup %4400 }
 0xcc1   :  { %v4403_v53 = vpop.eup %4402 }
 0xcc2   :  { %v2756_v54 = vmul.f32 %v4403_v53, %v4401_v51 }
 0xcc4   :  { %2758 = vrot.lane.b32.xlu1 %v2756_v54, %s4537_s3 }
 0xd30   :  { %v2860_v55 = vpop.permute.xlu0 %2859 }
 0xd31   :  { %v2862_v59 = vmul.f32 %v4395_v36, %v2860_v55 }
 0xd33   :  { %2872 = vrot.lane.b32.xlu0 %v2862_v59, %s4538_s14 }
 0xd36   :  { %v2759_v60 = vpop.permute.xlu1 %2758 }
 0xd37   :  { %2761 = vst.msk [vmem:[#allocation7 + $0x10] sm:$0xff] %vm2053_vm5, %v2759_v60 }
 0xd3e   :  { %v5296_v29 = vld [vmem:[#allocation7 + $0x10] sm:$0xff] }
 0xda5   :  { %v2873_v62 = vpop.permute.xlu0 %2872 }
 0xda6   :  { %3617 = vmatmul.mubr.msk.f32.vlgmr.msra.gmra.mrb[20].mxu0 %vm1706_vm1, %v2873_v62 }
 0xda7   :  { %4186 = vmatpush1.bf16.msra.mxu0 %v5023_v21  ;;  %3029 = vmatprep.mubr.f32.mxu0 %v4535_v58  ;;  %v3151_v21 = vld [vmem:[#allocation13 + $0x10] sm:$0xff] }
 0xda8   :  { %4188 = vmatprep.subr.bf16.mxu0 %v5025_v23  ;;  %v5203_v23 = vpack.c.bf16 %v3152_v20, %v3151_v21 }
 0xdab   :  { %4190 = vmatpush1.bf16.msra.mxu0 %v5041_v2  ;;  %v3153_v2 = vld [vmem:[#allocation13 + $0x20] sm:$0xff] }
 0xdac   :  { %4192 = vmatprep.subr.bf16.mxu0 %v5045_v28  ;;  %v3154_v28 = vld [vmem:[#allocation13 + $0x28] sm:$0xff] }
 0xdaf   :  { %4194 = vmatpush1.bf16.msra.mxu0 %v5060_v7  ;;  %v5209_v7 = vpack.c.bf16 %v3154_v28, %v3153_v2 }
 0xdb0   :  { %4196 = vmatprep.subr.bf16.mxu0 %v5063_v35  ;;  %v3155_v35 = vld [vmem:[#allocation13 + $0x30] sm:$0xff] }
 0xdb3   :  { %4198 = vmatpush1.bf16.msra.mxu0 %v5072_v38  ;;  %v3156_v38 = vld [vmem:[#allocation13 + $0x38] sm:$0xff] }
 0xdb4   :  { %4223 = vmatprep.subr.bf16.mxu0 %v4534_v57  ;;  %v5213_v46 = vpack.c.bf16 %v3156_v38, %v3155_v35 }
 0xdb6   :  { %3618 = vmatmul.mubr.msk.f32.vlgmr.msra.gmra.mrb[20].mxu0 %vm2053_vm5, %v2759_v60 }
 0xdb7   :  { %4225 = vmatpush3.bf16.msra.mxu0 %v5198_v3  ;;  %4018 = vmatprep.mubr.msk.f32.mxu0 %vm4536_vm4, %v4535_v58 }
 0xdb8   :  { %4226 = vmatprep.subr.bf16.mxu0 %v4534_v57 }
 0xdbb   :  { %4228 = vmatpush3.bf16.msra.mxu0 %v5203_v23 }
 0xdbc   :  { %4229 = vmatprep.subr.bf16.mxu0 %v4534_v57 }
 0xdbf   :  { %4231 = vmatpush3.bf16.msra.mxu0 %v5209_v7 }
 0xdc0   :  { %4232 = vmatprep.subr.bf16.mxu0 %v4534_v57 }
 0xdc3   :  { %4234 = vmatpush3.bf16.msra.mxu0 %v5213_v46 }
 0xdc4   :  { %4247 = vmatprep.subr.bf16.mxu0 %v4534_v57 }
 0xdc6   :  { %4019 = vmatmul.mubr.msk.f32.vlgmr.msra.gmra.mrb[22].mxu0 %vm2053_vm5, %v5218_v47 }
 0xdc7   :  { %4249 = vmatpush3.bf16.msra.mxu0 %v5198_v3  ;;  %4056 = vmatprep.mubr.msk.f32.mxu0 %vm4536_vm4, %v4535_v58 }
 0xdc8   :  { %4250 = vmatprep.subr.bf16.mxu0 %v4534_v57 }
 0xdcb   :  { %4252 = vmatpush3.bf16.msra.mxu0 %v5203_v23 }
 0xdcc   :  { %4253 = vmatprep.subr.bf16.mxu0 %v4534_v57 }
 0xdcf   :  { %4255 = vmatpush3.bf16.msra.mxu0 %v5209_v7 }
 0xdd0   :  { %4256 = vmatprep.subr.bf16.mxu0 %v4534_v57 }
 0xdd3   :  { %4258 = vmatpush3.bf16.msra.mxu0 %v5213_v46 }
 0xe89   :  { %v3031_v5 = vpop.f32.mrb[20].mxu0 }
 0xe8a   :  { %v4269_v48 = vadd.f32 %v3031_v5, %v5095_v41  ;;  %v3033_v9 = vpop.f32.mrb[21].mxu0  ;;  %v3065_v41 = vld [vmem:[%s5332_s7] sm:$0xff] }
 0xe8b   :  { %v4270_v11 = vadd.f32 %v3033_v9, %v5099_v52  ;;  %v3066_v52 = vld [vmem:[%s5332_s7 + $0x8] sm:$0xff] }
 0xe8c   :  { %v3619_v10 = vmul.f32 -1.442695, %v4269_v48  ;;  %v4200_v56 = vpack.c.bf16 %v3066_v52, %v3065_v41 }
 0xe8d   :  { %v3620_v30 = vmul.f32 -1.442695, %v4270_v11 }
 0xe8e   :  { %4404 = vpow2.f32 %v3619_v10  ;;  %4201 = vmatpush3.bf16.msra.mxu1 %v4200_v56 }
 0xe8f   :  { %4406 = vtanh.f32 %v4270_v11  ;;  %4202 = vmatprep.subr.bf16.mxu1 %v4534_v57 }
 0xe92   :  { %4204 = vmatpush3.bf16.msra.mxu1 %v4203_v22 }
 0xe93   :  { %4205 = vmatprep.subr.bf16.mxu1 %v4534_v57 }
 0xe96   :  { %4207 = vmatpush3.bf16.msra.mxu1 %v4206_v61 }
 0xe97   :  { %4208 = vmatprep.subr.bf16.mxu1 %v4534_v57 }
 0xe98   :  { %v4405_v12 = vpop.eup %4404 }
 0xe99   :  { %v3041_v15 = vadd.f32 1.0, %v4405_v12  ;;  %v5233_v16 = vpop.f32.mrb[22].mxu0  ;;  %v4407_v8 = vpop.eup %4406 }
 0xe9a   :  { %v4020_v6 = vpop.f32.mrb[23].mxu0  ;;  %4210 = vmatpush3.bf16.msra.mxu1 %v4209_v27 }
 0xe9b   :  { %4408 = vrcp.f32 %v3041_v15  ;;  %4211 = vmatprep.subr.bf16.mxu1 %v4534_v57 }
 0xe9c   :  { %4410 = vpow2.f32 %v3620_v30 }
 0xea5   :  { %v4409_v13 = vpop.eup %4408 }
 0xea6   :  { %v3052_v17 = vmul.f32 %v4409_v13, %v4407_v8  ;;  %v4411_v31 = vpop.eup %4410  ;;  %v3051_v33 = vmul.f32 %v4409_v13, %v5182_v49 }
 0xea7   :  { %v3048_v32 = vadd.f32 1.0, %v4411_v31 }
 0xea8   :  { %3054 = vrot.lane.b32.xlu0 %v3052_v17, %s4537_s3 }
 0xea9   :  { %4412 = vrcp.f32 %v3048_v32 }
 0xeb3   :  { %v4413_v37 = vpop.eup %4412 }
 0xf1a   :  { %v3055_v34 = vpop.permute.xlu0 %3054 }
 0xf1b   :  { %v3057_v36 = vadd.f32 %v3055_v34, %v3051_v33 }
 0xf1d   :  { %4414 = vtanh.f32 %v3057_v36  ;;  %3074 = vrot.lane.b32.xlu1 %v3057_v36, %s4537_s3 }
 0xf27   :  { %v4415_v39 = vpop.eup %4414 }
 0xf28   :  { %v3059_v26 = vmul.f32 %v4415_v39, %v4413_v37 }
 0xf2a   :  { %3061 = vrot.lane.b32.xlu0 %v3059_v26, %s4537_s3 }
 0xf8f   :  { %v3075_v40 = vpop.permute.xlu1 %3074 }
 0xf90   :  { %3981 = vmatmul.mubr.msk.f32.vlgmr.msra.gmra.mrb[24].mxu1 %vm2053_vm5, %v3075_v40 }
 0xf91   :  { %4213 = vmatpush3.bf16.msra.mxu1 %v5198_v3  ;;  %3999 = vmatprep.mubr.msk.f32.mxu1 %vm4536_vm4, %v4535_v58 }
 0xf92   :  { %4214 = vmatprep.subr.bf16.mxu1 %v4534_v57 }
 0xf95   :  { %4216 = vmatpush3.bf16.msra.mxu1 %v5203_v23 }
 0xf96   :  { %4217 = vmatprep.subr.bf16.mxu1 %v4534_v57 }
 0xf99   :  { %4219 = vmatpush3.bf16.msra.mxu1 %v5209_v7 }
 0xf9a   :  { %4220 = vmatprep.subr.bf16.mxu1 %v4534_v57 }
 0xf9c   :  { %v3062_v42 = vpop.permute.xlu0 %3061 }
 0xf9d   :  { %4222 = vmatpush3.bf16.msra.mxu1 %v5213_v46  ;;  %3064 = vst.msk [vmem:[#allocation7 + $0x18] sm:$0xff] %vm2053_vm5, %v3062_v42 }
 0xf9e   :  { %4235 = vmatprep.subr.bf16.mxu1 %v4534_v57 }
 0xfa0   :  { %4000 = vmatmul.mubr.msk.f32.vlgmr.msra.gmra.mrb[26].mxu1 %vm2053_vm5, %v5279_v43 }
 0xfa1   :  { %4237 = vmatpush3.bf16.msra.mxu1 %v5198_v3  ;;  %4037 = vmatprep.mubr.msk.f32.mxu1 %vm4536_vm4, %v4535_v58  ;;  %v95_v58 = vld [vmem:[%s5334_s9 + $0x4] ss:$0 sm:$0xff] }
 0xfa2   :  { %4238 = vmatprep.subr.bf16.mxu1 %v4534_v57 }
 0xfa4   :  { %v5287_v44 = vld [vmem:[#allocation7 + $0x18] sm:$0xff] }
 0xfa5   :  { %4240 = vmatpush3.bf16.msra.mxu1 %v5203_v23  ;;  %4057 = vmatmul.mubr.msk.f32.vlgmr.msra.gmra.mrb[24].mxu0 %vm2053_vm5, %v5287_v44 }
 0xfa6   :  { %4241 = vmatprep.subr.bf16.mxu1 %v4534_v57 }
 0xfa9   :  { %4243 = vmatpush3.bf16.msra.mxu1 %v5209_v7 }
 0xfaa   :  { %4244 = vmatprep.subr.bf16.mxu1 %v4534_v57  ;;  %v96_v57 = vld [vmem:[%s5334_s9 + $0x5] ss:$0 sm:$0xff] }
 0xfad   :  { %4246 = vmatpush3.bf16.msra.mxu1 %v5213_v46 }
 0xfb0   :  { %4038 = vmatmul.mubr.msk.f32.vlgmr.msra.gmra.mrb[28].mxu1 %vm2053_vm5, %v5296_v29 }
0x1063   :  { %v3144_v4 = vpop.f32.mrb[24].mxu1 }
0x1064   :  { %v3145_v45 = vadd.f32 %v3144_v4, %v95_v58  ;;  %v3982_v49 = vpop.f32.mrb[25].mxu1  ;;  %v97_v58 = vld [vmem:[%s5334_s9 + $0x6] ss:$0 sm:$0xff] }
0x1066   :  { %v3306_v50 = vadd.f32 %v5233_v16, %v3145_v45 }
0x1068   :  { %4416 = vtanh.f32 %v3306_v50 }
0x1072   :  { %v4417_v51 = vpop.eup %4416 }
0x1073   :  { %v3226_v53 = vpop.f32.mrb[26].mxu1  ;;  %v3310_v54 = vmul.f32 %v4417_v51, %v96_v57 }
0x1074   :  { %v3227_v55 = vadd.f32 %v3226_v53, %v3145_v45  ;;  %v4001_v59 = vpop.f32.mrb[27].mxu1 }
0x1075   :  { %v3311_v60 = vsel %vm2053_vm5, %v3310_v54, 0.0 }
0x1076   :  { %4418 = vtanh.f32 %v3227_v55  ;;  %3312 = vadd.xlane.f32.xlu0 %v3311_v60 }
0x1078   :  { %v3463_v62 = vpop.f32.mrb[24].mxu0 }
0x1079   :  { %v3464_v63 = vadd.f32 %v3463_v62, %v3145_v45  ;;  %v4058_v1 = vpop.f32.mrb[25].mxu0 }
0x107b   :  { %4420 = vtanh.f32 %v3464_v63 }
0x1080   :  { %v4419_v3 = vpop.eup %4418 }
0x1081   :  { %v3231_v21 = vmul.f32 %v4419_v3, %v96_v57 }
0x1083   :  { %v3384_v20 = vpop.f32.mrb[28].mxu1  ;;  %v3232_v23 = vsel %vm2053_vm5, %v3231_v21, 0.0 }
0x1084   :  { %v3385_v2 = vadd.f32 %v3384_v20, %v3145_v45  ;;  %3233 = vadd.xlane.f32.xlu1 %v3232_v23  ;;  %v4039_v28 = vpop.f32.mrb[29].mxu1 }
0x1085   :  { %v4421_v7 = vpop.eup %4420 }
0x1086   :  { %4422 = vtanh.f32 %v3385_v2  ;;  %v3468_v35 = vmul.f32 %v4421_v7, %v96_v57 }
0x1088   :  { %v3469_v38 = vsel %vm2053_vm5, %v3468_v35, 0.0 }
0x1089   :  { %3470 = vadd.xlane.f32.xlu1 %v3469_v38 }
0x1090   :  { %v4423_v46 = vpop.eup %4422 }
0x1091   :  { %v3389_v5 = vmul.f32 %v4423_v46, %v96_v57 }
0x1093   :  { %v3390_v48 = vsel %vm2053_vm5, %v3389_v5, 0.0 }
0x1094   :  { %3391 = vadd.xlane.f32.xlu0 %v3390_v48 }
0x1103   :  { %v3313_v9 = vpop.xlane.xlu0 %3312 }
0x1111   :  { %v3234_v10 = vpop.xlane.xlu1 %3233 }
0x1112   :  { %v3472_v11 = vmax.f32 %v3234_v10, %v3313_v9 }
0x1116   :  { %v3471_v16 = vpop.xlane.xlu1 %3470 }
0x1121   :  { %v3392_v12 = vpop.xlane.xlu0 %3391 }
0x1122   :  { %v3473_v15 = vmax.f32 %v3472_v11, %v3392_v12 }
0x1124   :  { %v3474_v6 = vmax.f32 %v3473_v15, %v3471_v16 }
0x1126   :  { %v3475_v8 = vsub.f32 %v3234_v10, %v3474_v6  ;;  %v3478_v13 = vsub.f32 %v3313_v9, %v3474_v6  ;;  %v3481_v17 = vsub.f32 %v3392_v12, %v3474_v6  ;;  %v3484_v41 = vsub.f32 %v3471_v16, %v3474_v6 }
0x1128   :  { %v3476_v52 = vmul.f32 1.442695, %v3475_v8  ;;  %v3479_v14 = vmul.f32 1.442695, %v3478_v13  ;;  %v3482_v56 = vmul.f32 1.442695, %v3481_v17 }
0x1129   :  { %v3485_v18 = vmul.f32 1.442695, %v3484_v41 }
0x112a   :  { %4424 = vpow2.f32 %v3476_v52 }
0x112b   :  { %4426 = vpow2.f32 %v3479_v14 }
0x112c   :  { %4428 = vpow2.f32 %v3482_v56 }
0x112d   :  { %4430 = vpow2.f32 %v3485_v18 }
0x1134   :  { %v4425_v22 = vpop.eup %4424 }
0x1135   :  { %v4427_v19 = vpop.eup %4426 }
0x1136   :  { %v3487_v0 = vadd.f32 %v4427_v19, %v4425_v22  ;;  %v4429_v61 = vpop.eup %4428 }
0x1137   :  { %v4431_v25 = vpop.eup %4430 }
0x1138   :  { %v3488_v24 = vadd.f32 %v4429_v61, %v3487_v0 }
0x113a   :  { %v3489_v27 = vadd.f32 %v4431_v25, %v3488_v24 }
0x113c   :  { %4432 = vrcp.f32 %v3489_v27 }
0x1146   :  { %v4433_v30 = vpop.eup %4432 }
0x1147   :  { %v3491_v31 = vmul.f32 %v4433_v30, %v4425_v22  ;;  %v3494_v32 = vmul.f32 %v4433_v30, %v4427_v19  ;;  %v3497_v33 = vmul.f32 %v4433_v30, %v4429_v61  ;;  %v3500_v37 = vmul.f32 %v4433_v30, %v4431_v25 }
0x1149   :  { %v3492_v34 = vmul.f32 %v3491_v31, %v5279_v43  ;;  %v3495_v36 = vmul.f32 %v3494_v32, %v5218_v47  ;;  %v3498_v26 = vmul.f32 %v3497_v33, %v5296_v29  ;;  %v3501_v42 = vmul.f32 %v3500_v37, %v5287_v44  ;;  %v98_v47 = vld [vmem:[%s5334_s9 + $0x7] ss:$0 sm:$0xff] }
0x114b   :  { %v3496_v39 = vadd.f32 %v3495_v36, %v3492_v34 }
0x114d   :  { %v3499_v40 = vadd.f32 %v3498_v26, %v3496_v39 }
0x114f   :  { %v3502_v4 = vadd.f32 %v3501_v42, %v3499_v40 }
0x1151   :  { %v3503_v45 = vmul.f32 %v3502_v4, %v97_v58 }
0x1153   :  { %v3504_v49 = vsel %vm2053_vm5, %v3503_v45, 0.0 }
0x1154   :  { %3505 = vadd.xlane.f32.xlu0 %v3504_v49 }
0x11e1   :  { %v3506_v43 = vpop.xlane.xlu0 %3505 }
0x11e2   :  { %v3507_v50 = vadd.f32 %v3506_v43, %v98_v47 }
0x11e4   :  { %3509 = vst.msk [vmem:[%s5335_s10] sm:$0xff] %vm3508_vm6, %v3507_v50 }
0x11e5   :  { %3514 = vsyncpa [#allocation9], 1 }
0x11e6   :  { %3515 = vsyncpa [#allocation11], 1 }
0x11e7   :  { %3516 = vsyncpa [#allocation14], 1 }

</bundles_post_ra>
